<compile_context>
chip_gen: v7x
topology: tpu7x:2x2x1
jax: 0.10.0
libtpu: 0.0.40
codegen_flags: <defaults>
</compile_context>

<pallas_src>
import functools

import jax
import jax.numpy as jnp
from jax import lax
from jax.experimental import pallas as pl
from jax.experimental.pallas import tpu as pltpu

EPS = 1e-5  # nn.BatchNorm2d default eps


def aux_head_kernel(x_ref, w1_ref, b1_ref, w2_ref, b2_ref, wl_ref, bl_ref,
                    out_ref):
    tn = x_ref.shape[0]

    # --- ReLU + AvgPool2d(5, stride=3, pad=0) on 8x8 -> 2x2 ------------------
    # Row-lazy: load + relu one H-row slice at a time (f32), never the full
    # (TN,8,8,C) block.  Rows/cols 3..4 are shared by the overlapping windows.
    # The 1/25 divisor is folded into w1.
    def rrow(h):                                        # (TN, 8, C) f32
        return jnp.maximum(x_ref[:, h].astype(jnp.float32), 0.0)

    mid = rrow(3) + rrow(4)                             # rows 3,4 (shared)
    r0 = rrow(0) + rrow(1) + rrow(2) + mid              # rows 0..4
    r1 = mid + rrow(5) + rrow(6) + rrow(7)              # rows 3..7

    def wsum(r):                                        # (TN, 8, C) -> 2x (TN, C)
        sh = r[:, 3] + r[:, 4]                          # cols 3,4 (shared)
        return (r[:, 0] + r[:, 1] + r[:, 2] + sh,       # cols 0..4
                sh + r[:, 5] + r[:, 6] + r[:, 7])       # cols 3..7

    p00, p01 = wsum(r0)
    p10, p11 = wsum(r1)

    # --- 1x1 conv + BN + ReLU, fused over the 4 pooled positions -------------
    # Positions stacked along sublanes -> one (4*TN, C) @ (C, 128) MXU matmul.
    # Cast each position to bf16 before the concat.
    pooled = jnp.concatenate(
        [p.astype(jnp.bfloat16) for p in (p00, p01, p10, p11)], axis=0)
    h = jnp.dot(pooled, w1_ref[...], preferred_element_type=jnp.float32)
    h = jnp.maximum(h + b1_ref[...], 0.0)               # (4*TN, 128) f32

    # --- 2x2 conv + BN + ReLU as ONE K=512 matmul -----------------------------
    # Move positions from sublanes to lanes (each block = one 128-lane vreg,
    # cheap), then contract against the tap-concatenated (512, 768) weight.
    h_cat = jnp.concatenate(
        [h[pos * tn:(pos + 1) * tn].astype(jnp.bfloat16) for pos in range(4)],
        axis=1)                                         # (TN, 512) bf16
    z = jnp.dot(h_cat, w2_ref[...], preferred_element_type=jnp.float32)
    z = jnp.maximum(z + b2_ref[...], 0.0).astype(jnp.bfloat16)   # (TN, 768)

    # --- Linear classifier (lane-padded, unmasked store) ---------------------
    out_ref[...] = (jnp.dot(z, wl_ref[...],
                            preferred_element_type=jnp.float32) + bl_ref[...])


def fold_bn(gamma, beta, mean, var):
    scale = gamma / jnp.sqrt(var + EPS)
    shift = beta - mean * scale
    return scale, shift


def _round_up(v, m):
    return ((v + m - 1) // m) * m


def _pick_tile(N, C, nc_pad, max_tile):
    """VMEM-budgeted batch tile + >=2 grid steps (v7x megacore) heuristic."""
    n8 = _round_up(max(N, 1), 8)
    # Conservative per-sample VMEM bytes per grid step:
    per_sample = (2 * 64 * C * 2            # bf16 x block, double-buffered
                  + 6 * 8 * C * 4           # f32 relu'd-row / row-sum temps
                  + 4 * C * 6               # pooled positions (f32 + bf16)
                  + 4 * 128 * 4 + 512 * 2   # h (f32) + h_cat (bf16)
                  + 768 * 6                 # z (f32 + bf16)
                  + 2 * nc_pad * 4)         # f32 out block, double-buffered
    # Weights/biases (assume double-buffered by the pipeline) + slack.
    fixed = (2 * 2 * (C * 128 + 512 * 768 + 768 * nc_pad)
             + 4 * (128 + 768 + 2 * nc_pad) + (2 << 20))
    budget = 28 * 1024 * 1024               # fits v7x 64 MiB VMEM with headroom
    cap = max(8, ((budget - fixed) // per_sample) // 8 * 8)
    if n8 >= 16:
        # Guarantee at least 2 grid steps so both v7x TensorCores get work.
        cap = min(cap, _round_up(pl.cdiv(n8, 2), 8))
    tn = min(max_tile, cap, n8)
    tn = _round_up(tn, 8)
    vmem_est = fixed + tn * per_sample
    return tn, vmem_est


@functools.partial(jax.jit, static_argnums=(2,),
                   static_argnames=("tile_n", "input_format"))
def aux_head_forward(x, params, num_classes, *, tile_n=None,
                     input_format="NCHW"):
    """Pallas AuxiliaryHeadCIFAR.forward.

    NOTE: BatchNorm runs in inference mode (running statistics folded into the
    conv weights); PyTorch train-mode batch statistics are NOT reproduced.

    input_format: "NCHW" (PyTorch layout; transposed + cast to bf16 NHWC here,
    fused into one XLA op under jit) or "NHWC" to skip the transpose pass when
    the producer already emits channels-last activations.
    """
    if input_format == "NCHW":
        N, C, H, W = x.shape
        x = jnp.transpose(x, (0, 2, 3, 1))
    else:
        N, H, W, C = x.shape
    assert (H, W) == (8, 8), "AuxiliaryHeadCIFAR assumes 8x8 input"
    assert params['w1'].shape == (128, C, 1, 1)
    assert params['w2'].shape == (768, 128, 2, 2)
    x = x.astype(jnp.bfloat16)          # bf16 activations: halve HBM traffic

    # ---- BN folding / weight prep (f32 math, cast to bf16 at the end) -------
    s1, b1 = fold_bn(params['g1'], params['be1'], params['m1'], params['v1'])
    # fold BN scale and the 1/25 avg-pool divisor into the 1x1 conv weight
    w1 = (jnp.transpose(params['w1'][:, :, 0, 0], (1, 0))
          * (s1 / 25.0)[None, :]).astype(jnp.bfloat16)             # (C, 128)

    s2, b2 = fold_bn(params['g2'], params['be2'], params['m2'], params['v2'])
    # OIHW -> (kh, kw, c, o); taps concatenated along K -> (512, 768)
    w2 = (jnp.transpose(params['w2'], (2, 3, 1, 0)).reshape(4, 128, 768)
          * s2[None, None, :]).reshape(512, 768).astype(jnp.bfloat16)

    # classifier, lane-padded to a multiple of 128 output columns
    nc_pad = _round_up(max(num_classes, 1), 128)
    wl = jnp.zeros((768, nc_pad), jnp.float32).at[:, :num_classes].set(
        jnp.transpose(params['wlin'])).astype(jnp.bfloat16)
    bl = jnp.zeros((1, nc_pad), jnp.float32).at[0, :num_classes].set(
        params['blin'])

    # ---- batch grid / VMEM-aware tile ----------------------------------------
    max_tile = 128 if tile_n is None else max(8, _round_up(tile_n, 8))
    tn, vmem_est = _pick_tile(N, C, nc_pad, max_tile)
    n_pad = _round_up(max(N, 1), tn)
    if n_pad != N:
        x = jnp.pad(x, ((0, n_pad - N), (0, 0), (0, 0), (0, 0)))
    grid = (n_pad // tn,)

    flops = 2 * n_pad * (4 * C * 128 + 512 * 768 + 768 * nc_pad)
    bytes_accessed = (x.size * 2 + w1.size * 2 + w2.size * 2 + wl.size * 2
                      + (b1.size + b2.size + bl.size) * 4 + n_pad * nc_pad * 4)
    vmem_limit = int(min(max(int(vmem_est * 1.5), 32 * 1024 * 1024),
                         56 * 1024 * 1024))

    out = pl.pallas_call(
        aux_head_kernel,
        out_shape=jax.ShapeDtypeStruct((n_pad, nc_pad), jnp.float32),
        grid_spec=pltpu.PrefetchScalarGridSpec(
            num_scalar_prefetch=0,
            grid=grid,
            in_specs=[
                pl.BlockSpec((tn, 8, 8, C), lambda i: (i, 0, 0, 0)),   # x
                # Constant index_maps -> DMA'd once, VMEM-resident across the
                # whole grid (their double-buffered copies are accounted for
                # in the VMEM budget above).
                pl.BlockSpec((C, 128), lambda i: (0, 0)),              # w1
                pl.BlockSpec((1, 128), lambda i: (0, 0)),              # b1
                pl.BlockSpec((512, 768), lambda i: (0, 0)),            # w2
                pl.BlockSpec((1, 768), lambda i: (0, 0)),              # b2
                pl.BlockSpec((768, nc_pad), lambda i: (0, 0)),         # wl
                pl.BlockSpec((1, nc_pad), lambda i: (0, 0)),           # bl
            ],
            out_specs=pl.BlockSpec((tn, nc_pad), lambda i: (i, 0)),
        ),
        compiler_params=pltpu.CompilerParams(
            dimension_semantics=("parallel",),
            vmem_limit_bytes=vmem_limit),
        cost_estimate=pl.CostEstimate(flops=int(flops), transcendentals=0,
                                      bytes_accessed=int(bytes_accessed)),
    )(x, w1, b1.reshape(1, 128), w2, b2.reshape(1, 768), wl, bl)

    return out[:N, :num_classes]


def init_params(key, C, num_classes):
    ks = jax.random.split(key, 12)
    p = {}
    # Conv2d(C, 128, 1, bias=False) weight, PyTorch OIHW layout
    p['w1'] = jax.random.normal(ks[0], (128, C, 1, 1), jnp.float32) * 0.1
    # BatchNorm2d(128): gamma, beta, running_mean, running_var
    p['g1'] = jax.random.uniform(ks[1], (128,), jnp.float32, minval=0.5, maxval=1.5)
    p['be1'] = jax.random.normal(ks[2], (128,), jnp.float32) * 0.1
    p['m1'] = jax.random.normal(ks[3], (128,), jnp.float32) * 0.1
    p['v1'] = jax.random.uniform(ks[4], (128,), jnp.float32, minval=0.5, maxval=1.5)
    # Conv2d(128, 768, 2, bias=False) weight, OIHW
    p['w2'] = jax.random.normal(ks[5], (768, 128, 2, 2), jnp.float32) * 0.05
    # BatchNorm2d(768)
    p['g2'] = jax.random.uniform(ks[6], (768,), jnp.float32, minval=0.5, maxval=1.5)
    p['be2'] = jax.random.normal(ks[7], (768,), jnp.float32) * 0.1
    p['m2'] = jax.random.normal(ks[8], (768,), jnp.float32) * 0.1
    p['v2'] = jax.random.uniform(ks[9], (768,), jnp.float32, minval=0.5, maxval=1.5)
    # Linear(768, num_classes)
    p['wlin'] = jax.random.normal(ks[10], (num_classes, 768), jnp.float32) * 0.05
    p['blin'] = jax.random.normal(ks[11], (num_classes,), jnp.float32) * 0.1
    return p


def ref_forward(x_nchw, params):
    """Independent pure-JAX f32 reference (NCHW, lax conv / reduce_window)."""
    x = jnp.maximum(x_nchw.astype(jnp.float32), 0.0)
    pooled = lax.reduce_window(x, 0.0, lax.add, (1, 1, 5, 5), (1, 1, 3, 3),
                               'VALID') / 25.0
    dn = ('NCHW', 'OIHW', 'NCHW')
    h = lax.conv_general_dilated(pooled, params['w1'], (1, 1), 'VALID',
                                 dimension_numbers=dn)
    s1, b1 = fold_bn(params['g1'], params['be1'], params['m1'], params['v1'])
    h = jnp.maximum(h * s1[None, :, None, None] + b1[None, :, None, None], 0.0)
    z = lax.conv_general_dilated(h, params['w2'], (1, 1), 'VALID',
                                 dimension_numbers=dn)
    s2, b2 = fold_bn(params['g2'], params['be2'], params['m2'], params['v2'])
    z = jnp.maximum(z * s2[None, :, None, None] + b2[None, :, None, None], 0.0)
    z = z.reshape(z.shape[0], -1)                                      # (N,768)
    return z @ params['wlin'].T + params['blin'][None, :]


if __name__ == "__main__":
    key = jax.random.PRNGKey(0)
    kx, kp, kx2 = jax.random.split(key, 3)

    N, C, num_classes = 2, 16, 10
    params = init_params(kp, C, num_classes)

    # --- small primary test (single grid step) -------------------------------
    x = jax.random.normal(kx, (N, C, 8, 8), jnp.float32)
    out = jax.block_until_ready(aux_head_forward(x, params, num_classes))
    ref = jax.block_until_ready(ref_forward(x, params))
    assert out.shape == (N, num_classes)
    # bf16 activations + bf16 MXU operands vs f32 reference.
    assert jnp.allclose(out, ref, rtol=5e-2, atol=5e-2), (
        f"mismatch: max abs err {jnp.max(jnp.abs(out - ref))}")

    # --- multi-tile test: batch grid (auto tile -> >=2 steps), padding,
    #     weight residency across grid steps ----------------------------------
    N2 = 20
    x2 = jax.random.normal(kx2, (N2, C, 8, 8), jnp.float32)
    out2 = jax.block_until_ready(aux_head_forward(x2, params, num_classes))
    ref2 = ref_forward(x2, params)
    assert out2.shape == (N2, num_classes)
    assert jnp.allclose(out2, ref2, rtol=5e-2, atol=5e-2), (
        f"mismatch (gridded): max abs err {jnp.max(jnp.abs(out2 - ref2))}")

    print("KERNEL_OK")
</pallas_src>

<mosaic_0001>
module attributes {stable_mosaic.version = 11 : i64} {
  func.func @aux_head_kernel(%arg0: i32, %arg1: memref<8x8x8x16xbf16, #tpu.memory_space<vmem>>, %arg2: memref<16x128xbf16, #tpu.memory_space<vmem>>, %arg3: memref<1x128xf32, #tpu.memory_space<vmem>>, %arg4: memref<512x768xbf16, #tpu.memory_space<vmem>>, %arg5: memref<1x768xf32, #tpu.memory_space<vmem>>, %arg6: memref<768x128xbf16, #tpu.memory_space<vmem>>, %arg7: memref<1x128xf32, #tpu.memory_space<vmem>>, %arg8: memref<8x128xf32, #tpu.memory_space<vmem>>) attributes {dimension_semantics = [#tpu.dimension_semantics<parallel>], iteration_bounds = array<i64: 1>, scalar_prefetch = 0 : i64, scratch_operands = 0 : i64, tpu.core_type = #tpu.core_type<tc>, window_params = [{transform_indices = @transform_0, window_bounds = array<i64: 8, 8, 8, 16>}, {pipeline_mode = #tpu.pipeline_mode<synchronous>, transform_indices = @transform_1, window_bounds = array<i64: 16, 128>}, {pipeline_mode = #tpu.pipeline_mode<synchronous>, transform_indices = @transform_2, window_bounds = array<i64: 1, 128>}, {pipeline_mode = #tpu.pipeline_mode<synchronous>, transform_indices = @transform_3, window_bounds = array<i64: 512, 768>}, {pipeline_mode = #tpu.pipeline_mode<synchronous>, transform_indices = @transform_4, window_bounds = array<i64: 1, 768>}, {pipeline_mode = #tpu.pipeline_mode<synchronous>, transform_indices = @transform_5, window_bounds = array<i64: 768, 128>}, {pipeline_mode = #tpu.pipeline_mode<synchronous>, transform_indices = @transform_6, window_bounds = array<i64: 1, 128>}, {transform_indices = @transform_7, window_bounds = array<i64: 8, 128>}]} {
    %c0 = arith.constant 0 : index
    %c3 = arith.constant 3 : index
    %c0_0 = arith.constant 0 : index
    %c0_1 = arith.constant 0 : index
    %0 = vector.load %arg1[%c0, %c3, %c0_0, %c0_1] : memref<8x8x8x16xbf16, #tpu.memory_space<vmem>>, vector<8x1x8x16xbf16>
    %1 = vector.shape_cast %0 : vector<8x1x8x16xbf16> to vector<8x8x16xbf16>
    %2 = arith.extf %1 : vector<8x8x16xbf16> to vector<8x8x16xf32>
    %cst = arith.constant 0.000000e+00 : f32
    %3 = vector.broadcast %cst : f32 to vector<8x8x16xf32>
    %4 = arith.maximumf %2, %3 : vector<8x8x16xf32>
    %c0_2 = arith.constant 0 : index
    %c4 = arith.constant 4 : index
    %c0_3 = arith.constant 0 : index
    %c0_4 = arith.constant 0 : index
    %5 = vector.load %arg1[%c0_2, %c4, %c0_3, %c0_4] : memref<8x8x8x16xbf16, #tpu.memory_space<vmem>>, vector<8x1x8x16xbf16>
    %6 = vector.shape_cast %5 : vector<8x1x8x16xbf16> to vector<8x8x16xbf16>
    %7 = arith.extf %6 : vector<8x8x16xbf16> to vector<8x8x16xf32>
    %cst_5 = arith.constant 0.000000e+00 : f32
    %8 = vector.broadcast %cst_5 : f32 to vector<8x8x16xf32>
    %9 = arith.maximumf %7, %8 : vector<8x8x16xf32>
    %10 = arith.addf %4, %9 : vector<8x8x16xf32>
    %c0_6 = arith.constant 0 : index
    %c0_7 = arith.constant 0 : index
    %c0_8 = arith.constant 0 : index
    %c0_9 = arith.constant 0 : index
    %11 = vector.load %arg1[%c0_6, %c0_7, %c0_8, %c0_9] : memref<8x8x8x16xbf16, #tpu.memory_space<vmem>>, vector<8x1x8x16xbf16>
    %12 = vector.shape_cast %11 : vector<8x1x8x16xbf16> to vector<8x8x16xbf16>
    %13 = arith.extf %12 : vector<8x8x16xbf16> to vector<8x8x16xf32>
    %cst_10 = arith.constant 0.000000e+00 : f32
    %14 = vector.broadcast %cst_10 : f32 to vector<8x8x16xf32>
    %15 = arith.maximumf %13, %14 : vector<8x8x16xf32>
    %c0_11 = arith.constant 0 : index
    %c1 = arith.constant 1 : index
    %c0_12 = arith.constant 0 : index
    %c0_13 = arith.constant 0 : index
    %16 = vector.load %arg1[%c0_11, %c1, %c0_12, %c0_13] : memref<8x8x8x16xbf16, #tpu.memory_space<vmem>>, vector<8x1x8x16xbf16>
    %17 = vector.shape_cast %16 : vector<8x1x8x16xbf16> to vector<8x8x16xbf16>
    %18 = arith.extf %17 : vector<8x8x16xbf16> to vector<8x8x16xf32>
    %cst_14 = arith.constant 0.000000e+00 : f32
    %19 = vector.broadcast %cst_14 : f32 to vector<8x8x16xf32>
    %20 = arith.maximumf %18, %19 : vector<8x8x16xf32>
    %21 = arith.addf %15, %20 : vector<8x8x16xf32>
    %c0_15 = arith.constant 0 : index
    %c2 = arith.constant 2 : index
    %c0_16 = arith.constant 0 : index
    %c0_17 = arith.constant 0 : index
    %22 = vector.load %arg1[%c0_15, %c2, %c0_16, %c0_17] : memref<8x8x8x16xbf16, #tpu.memory_space<vmem>>, vector<8x1x8x16xbf16>
    %23 = vector.shape_cast %22 : vector<8x1x8x16xbf16> to vector<8x8x16xbf16>
    %24 = arith.extf %23 : vector<8x8x16xbf16> to vector<8x8x16xf32>
    %cst_18 = arith.constant 0.000000e+00 : f32
    %25 = vector.broadcast %cst_18 : f32 to vector<8x8x16xf32>
    %26 = arith.maximumf %24, %25 : vector<8x8x16xf32>
    %27 = arith.addf %21, %26 : vector<8x8x16xf32>
    %28 = arith.addf %27, %10 : vector<8x8x16xf32>
    %c0_19 = arith.constant 0 : index
    %c5 = arith.constant 5 : index
    %c0_20 = arith.constant 0 : index
    %c0_21 = arith.constant 0 : index
    %29 = vector.load %arg1[%c0_19, %c5, %c0_20, %c0_21] : memref<8x8x8x16xbf16, #tpu.memory_space<vmem>>, vector<8x1x8x16xbf16>
    %30 = vector.shape_cast %29 : vector<8x1x8x16xbf16> to vector<8x8x16xbf16>
    %31 = arith.extf %30 : vector<8x8x16xbf16> to vector<8x8x16xf32>
    %cst_22 = arith.constant 0.000000e+00 : f32
    %32 = vector.broadcast %cst_22 : f32 to vector<8x8x16xf32>
    %33 = arith.maximumf %31, %32 : vector<8x8x16xf32>
    %34 = arith.addf %10, %33 : vector<8x8x16xf32>
    %c0_23 = arith.constant 0 : index
    %c6 = arith.constant 6 : index
    %c0_24 = arith.constant 0 : index
    %c0_25 = arith.constant 0 : index
    %35 = vector.load %arg1[%c0_23, %c6, %c0_24, %c0_25] : memref<8x8x8x16xbf16, #tpu.memory_space<vmem>>, vector<8x1x8x16xbf16>
    %36 = vector.shape_cast %35 : vector<8x1x8x16xbf16> to vector<8x8x16xbf16>
    %37 = arith.extf %36 : vector<8x8x16xbf16> to vector<8x8x16xf32>
    %cst_26 = arith.constant 0.000000e+00 : f32
    %38 = vector.broadcast %cst_26 : f32 to vector<8x8x16xf32>
    %39 = arith.maximumf %37, %38 : vector<8x8x16xf32>
    %40 = arith.addf %34, %39 : vector<8x8x16xf32>
    %c0_27 = arith.constant 0 : index
    %c7 = arith.constant 7 : index
    %c0_28 = arith.constant 0 : index
    %c0_29 = arith.constant 0 : index
    %41 = vector.load %arg1[%c0_27, %c7, %c0_28, %c0_29] : memref<8x8x8x16xbf16, #tpu.memory_space<vmem>>, vector<8x1x8x16xbf16>
    %42 = vector.shape_cast %41 : vector<8x1x8x16xbf16> to vector<8x8x16xbf16>
    %43 = arith.extf %42 : vector<8x8x16xbf16> to vector<8x8x16xf32>
    %cst_30 = arith.constant 0.000000e+00 : f32
    %44 = vector.broadcast %cst_30 : f32 to vector<8x8x16xf32>
    %45 = arith.maximumf %43, %44 : vector<8x8x16xf32>
    %46 = arith.addf %40, %45 : vector<8x8x16xf32>
    %47 = vector.extract_strided_slice %28 {offsets = [0, 3, 0], sizes = [8, 1, 16], strides = [1, 1, 1]} : vector<8x8x16xf32> to vector<8x1x16xf32>
    %48 = vector.shape_cast %47 : vector<8x1x16xf32> to vector<8x16xf32>
    %49 = vector.extract_strided_slice %28 {offsets = [0, 4, 0], sizes = [8, 1, 16], strides = [1, 1, 1]} : vector<8x8x16xf32> to vector<8x1x16xf32>
    %50 = vector.shape_cast %49 : vector<8x1x16xf32> to vector<8x16xf32>
    %51 = arith.addf %48, %50 : vector<8x16xf32>
    %52 = vector.extract_strided_slice %28 {offsets = [0, 0, 0], sizes = [8, 1, 16], strides = [1, 1, 1]} : vector<8x8x16xf32> to vector<8x1x16xf32>
    %53 = vector.shape_cast %52 : vector<8x1x16xf32> to vector<8x16xf32>
    %54 = vector.extract_strided_slice %28 {offsets = [0, 1, 0], sizes = [8, 1, 16], strides = [1, 1, 1]} : vector<8x8x16xf32> to vector<8x1x16xf32>
    %55 = vector.shape_cast %54 : vector<8x1x16xf32> to vector<8x16xf32>
    %56 = arith.addf %53, %55 : vector<8x16xf32>
    %57 = vector.extract_strided_slice %28 {offsets = [0, 2, 0], sizes = [8, 1, 16], strides = [1, 1, 1]} : vector<8x8x16xf32> to vector<8x1x16xf32>
    %58 = vector.shape_cast %57 : vector<8x1x16xf32> to vector<8x16xf32>
    %59 = arith.addf %56, %58 : vector<8x16xf32>
    %60 = arith.addf %59, %51 : vector<8x16xf32>
    %61 = vector.extract_strided_slice %28 {offsets = [0, 5, 0], sizes = [8, 1, 16], strides = [1, 1, 1]} : vector<8x8x16xf32> to vector<8x1x16xf32>
    %62 = vector.shape_cast %61 : vector<8x1x16xf32> to vector<8x16xf32>
    %63 = arith.addf %51, %62 : vector<8x16xf32>
    %64 = vector.extract_strided_slice %28 {offsets = [0, 6, 0], sizes = [8, 1, 16], strides = [1, 1, 1]} : vector<8x8x16xf32> to vector<8x1x16xf32>
    %65 = vector.shape_cast %64 : vector<8x1x16xf32> to vector<8x16xf32>
    %66 = arith.addf %63, %65 : vector<8x16xf32>
    %67 = vector.extract_strided_slice %28 {offsets = [0, 7, 0], sizes = [8, 1, 16], strides = [1, 1, 1]} : vector<8x8x16xf32> to vector<8x1x16xf32>
    %68 = vector.shape_cast %67 : vector<8x1x16xf32> to vector<8x16xf32>
    %69 = arith.addf %66, %68 : vector<8x16xf32>
    %70 = vector.extract_strided_slice %46 {offsets = [0, 3, 0], sizes = [8, 1, 16], strides = [1, 1, 1]} : vector<8x8x16xf32> to vector<8x1x16xf32>
    %71 = vector.shape_cast %70 : vector<8x1x16xf32> to vector<8x16xf32>
    %72 = vector.extract_strided_slice %46 {offsets = [0, 4, 0], sizes = [8, 1, 16], strides = [1, 1, 1]} : vector<8x8x16xf32> to vector<8x1x16xf32>
    %73 = vector.shape_cast %72 : vector<8x1x16xf32> to vector<8x16xf32>
    %74 = arith.addf %71, %73 : vector<8x16xf32>
    %75 = vector.extract_strided_slice %46 {offsets = [0, 0, 0], sizes = [8, 1, 16], strides = [1, 1, 1]} : vector<8x8x16xf32> to vector<8x1x16xf32>
    %76 = vector.shape_cast %75 : vector<8x1x16xf32> to vector<8x16xf32>
    %77 = vector.extract_strided_slice %46 {offsets = [0, 1, 0], sizes = [8, 1, 16], strides = [1, 1, 1]} : vector<8x8x16xf32> to vector<8x1x16xf32>
    %78 = vector.shape_cast %77 : vector<8x1x16xf32> to vector<8x16xf32>
    %79 = arith.addf %76, %78 : vector<8x16xf32>
    %80 = vector.extract_strided_slice %46 {offsets = [0, 2, 0], sizes = [8, 1, 16], strides = [1, 1, 1]} : vector<8x8x16xf32> to vector<8x1x16xf32>
    %81 = vector.shape_cast %80 : vector<8x1x16xf32> to vector<8x16xf32>
    %82 = arith.addf %79, %81 : vector<8x16xf32>
    %83 = arith.addf %82, %74 : vector<8x16xf32>
    %84 = vector.extract_strided_slice %46 {offsets = [0, 5, 0], sizes = [8, 1, 16], strides = [1, 1, 1]} : vector<8x8x16xf32> to vector<8x1x16xf32>
    %85 = vector.shape_cast %84 : vector<8x1x16xf32> to vector<8x16xf32>
    %86 = arith.addf %74, %85 : vector<8x16xf32>
    %87 = vector.extract_strided_slice %46 {offsets = [0, 6, 0], sizes = [8, 1, 16], strides = [1, 1, 1]} : vector<8x8x16xf32> to vector<8x1x16xf32>
    %88 = vector.shape_cast %87 : vector<8x1x16xf32> to vector<8x16xf32>
    %89 = arith.addf %86, %88 : vector<8x16xf32>
    %90 = vector.extract_strided_slice %46 {offsets = [0, 7, 0], sizes = [8, 1, 16], strides = [1, 1, 1]} : vector<8x8x16xf32> to vector<8x1x16xf32>
    %91 = vector.shape_cast %90 : vector<8x1x16xf32> to vector<8x16xf32>
    %92 = arith.addf %89, %91 : vector<8x16xf32>
    %93 = arith.truncf %60 : vector<8x16xf32> to vector<8x16xbf16>
    %94 = arith.truncf %69 : vector<8x16xf32> to vector<8x16xbf16>
    %95 = arith.truncf %83 : vector<8x16xf32> to vector<8x16xbf16>
    %96 = arith.truncf %92 : vector<8x16xf32> to vector<8x16xbf16>
    %97 = tpu.concatenate %93, %94, %95, %96 in 0 : vector<8x16xbf16>, vector<8x16xbf16>, vector<8x16xbf16>, vector<8x16xbf16> -> vector<32x16xbf16>
    %c0_31 = arith.constant 0 : index
    %c0_32 = arith.constant 0 : index
    %98 = vector.load %arg2[%c0_31, %c0_32] : memref<16x128xbf16, #tpu.memory_space<vmem>>, vector<16x128xbf16>
    %cst_33 = arith.constant dense<0.000000e+00> : vector<32x128xf32>
    %99 = tpu.matmul %97, %98, %cst_33 {dimension_numbers = #tpu.dot_dimension_numbers<[1], [0], [0], [1], [0, 0, 1, 1], [], []>} : vector<32x16xbf16>, vector<16x128xbf16>, vector<32x128xf32> -> vector<32x128xf32>
    %c0_34 = arith.constant 0 : index
    %c0_35 = arith.constant 0 : index
    %100 = vector.load %arg3[%c0_34, %c0_35] : memref<1x128xf32, #tpu.memory_space<vmem>>, vector<1x128xf32>
    %101 = vector.broadcast %100 : vector<1x128xf32> to vector<32x128xf32>
    %102 = arith.addf %99, %101 : vector<32x128xf32>
    %cst_36 = arith.constant 0.000000e+00 : f32
    %103 = vector.broadcast %cst_36 : f32 to vector<32x128xf32>
    %104 = arith.maximumf %102, %103 : vector<32x128xf32>
    %105 = vector.extract_strided_slice %104 {offsets = [0, 0], sizes = [8, 128], strides = [1, 1]} : vector<32x128xf32> to vector<8x128xf32>
    %106 = arith.truncf %105 : vector<8x128xf32> to vector<8x128xbf16>
    %107 = vector.extract_strided_slice %104 {offsets = [8, 0], sizes = [8, 128], strides = [1, 1]} : vector<32x128xf32> to vector<8x128xf32>
    %108 = arith.truncf %107 : vector<8x128xf32> to vector<8x128xbf16>
    %109 = vector.extract_strided_slice %104 {offsets = [16, 0], sizes = [8, 128], strides = [1, 1]} : vector<32x128xf32> to vector<8x128xf32>
    %110 = arith.truncf %109 : vector<8x128xf32> to vector<8x128xbf16>
    %111 = vector.extract_strided_slice %104 {offsets = [24, 0], sizes = [8, 128], strides = [1, 1]} : vector<32x128xf32> to vector<8x128xf32>
    %112 = arith.truncf %111 : vector<8x128xf32> to vector<8x128xbf16>
    %113 = tpu.concatenate %106, %108, %110, %112 in 1 : vector<8x128xbf16>, vector<8x128xbf16>, vector<8x128xbf16>, vector<8x128xbf16> -> vector<8x512xbf16>
    %c0_37 = arith.constant 0 : index
    %c0_38 = arith.constant 0 : index
    %114 = vector.load %arg4[%c0_37, %c0_38] : memref<512x768xbf16, #tpu.memory_space<vmem>>, vector<512x768xbf16>
    %cst_39 = arith.constant dense<0.000000e+00> : vector<8x768xf32>
    %115 = tpu.matmul %113, %114, %cst_39 {dimension_numbers = #tpu.dot_dimension_numbers<[1], [0], [0], [1], [0, 0, 1, 1], [], []>} : vector<8x512xbf16>, vector<512x768xbf16>, vector<8x768xf32> -> vector<8x768xf32>
    %c0_40 = arith.constant 0 : index
    %c0_41 = arith.constant 0 : index
    %116 = vector.load %arg5[%c0_40, %c0_41] : memref<1x768xf32, #tpu.memory_space<vmem>>, vector<1x768xf32>
    %117 = vector.broadcast %116 : vector<1x768xf32> to vector<8x768xf32>
    %118 = arith.addf %115, %117 : vector<8x768xf32>
    %cst_42 = arith.constant 0.000000e+00 : f32
    %119 = vector.broadcast %cst_42 : f32 to vector<8x768xf32>
    %120 = arith.maximumf %118, %119 : vector<8x768xf32>
    %121 = arith.truncf %120 : vector<8x768xf32> to vector<8x768xbf16>
    %c0_43 = arith.constant 0 : index
    %c0_44 = arith.constant 0 : index
    %122 = vector.load %arg6[%c0_43, %c0_44] : memref<768x128xbf16, #tpu.memory_space<vmem>>, vector<768x128xbf16>
    %cst_45 = arith.constant dense<0.000000e+00> : vector<8x128xf32>
    %123 = tpu.matmul %121, %122, %cst_45 {dimension_numbers = #tpu.dot_dimension_numbers<[1], [0], [0], [1], [0, 0, 1, 1], [], []>} : vector<8x768xbf16>, vector<768x128xbf16>, vector<8x128xf32> -> vector<8x128xf32>
    %c0_46 = arith.constant 0 : index
    %c0_47 = arith.constant 0 : index
    %124 = vector.load %arg7[%c0_46, %c0_47] : memref<1x128xf32, #tpu.memory_space<vmem>>, vector<1x128xf32>
    %125 = vector.broadcast %124 : vector<1x128xf32> to vector<8x128xf32>
    %126 = arith.addf %123, %125 : vector<8x128xf32>
    %c0_48 = arith.constant 0 : index
    %c0_49 = arith.constant 0 : index
    %127 = vector.load %arg8[%c0_48, %c0_49] : memref<8x128xf32, #tpu.memory_space<vmem>>, vector<8x128xf32>
    tpu.vector_store %arg8[%c0_48, %c0_49], %126 {strides = array<i32>} : memref<8x128xf32, #tpu.memory_space<vmem>>, vector<8x128xf32>,
    return
  }
  func.func @transform_0(%arg0: i32) -> (i32, i32, i32, i32) {
    %c0_i32 = arith.constant 0 : i32
    %c0_i32_0 = arith.constant 0 : i32
    %c0_i32_1 = arith.constant 0 : i32
    %c0_i32_2 = arith.constant 0 : i32
    return %arg0, %c0_i32, %c0_i32_0, %c0_i32_1 : i32, i32, i32, i32
  }
  func.func @transform_1(%arg0: i32) -> (i32, i32) {
    %c0_i32 = arith.constant 0 : i32
    %c0_i32_0 = arith.constant 0 : i32
    %c0_i32_1 = arith.constant 0 : i32
    return %c0_i32, %c0_i32_0 : i32, i32
  }
  func.func @transform_2(%arg0: i32) -> (i32, i32) {
    %c0_i32 = arith.constant 0 : i32
    %c0_i32_0 = arith.constant 0 : i32
    %c0_i32_1 = arith.constant 0 : i32
    return %c0_i32, %c0_i32_0 : i32, i32
  }
  func.func @transform_3(%arg0: i32) -> (i32, i32) {
    %c0_i32 = arith.constant 0 : i32
    %c0_i32_0 = arith.constant 0 : i32
    %c0_i32_1 = arith.constant 0 : i32
    return %c0_i32, %c0_i32_0 : i32, i32
  }
  func.func @transform_4(%arg0: i32) -> (i32, i32) {
    %c0_i32 = arith.constant 0 : i32
    %c0_i32_0 = arith.constant 0 : i32
    %c0_i32_1 = arith.constant 0 : i32
    return %c0_i32, %c0_i32_0 : i32, i32
  }
  func.func @transform_5(%arg0: i32) -> (i32, i32) {
    %c0_i32 = arith.constant 0 : i32
    %c0_i32_0 = arith.constant 0 : i32
    %c0_i32_1 = arith.constant 0 : i32
    return %c0_i32, %c0_i32_0 : i32, i32
  }
  func.func @transform_6(%arg0: i32) -> (i32, i32) {
    %c0_i32 = arith.constant 0 : i32
    %c0_i32_0 = arith.constant 0 : i32
    %c0_i32_1 = arith.constant 0 : i32
    return %c0_i32, %c0_i32_0 : i32, i32
  }
  func.func @transform_7(%arg0: i32) -> (i32, i32) {
    %c0_i32 = arith.constant 0 : i32
    %c0_i32_0 = arith.constant 0 : i32
    return %arg0, %c0_i32 : i32, i32
  }
}

</mosaic_0001>

<bundles_post_ra>
// kernel: aux_head_forward.1
= control target key start
LH: loop header
LB: loop body
LE: loop exit
PB: predicated region body
PF: predicated region fallthrough
CT: control target
= control target key end

     0   :  { %vm603_vm0 = vcmask 1041409   ;;  %vm606_vm1 = vcmask 1042434   ;;  %vm609_vm2 = vcmask 1043459   ;;  %vm612_vm3 = vcmask 1044484   ;;  %s4696_s1 = inlined_call_operand.vmem [shape: bf16[16,128], index: 1, kind: input, shape index: {}]   ;;  %s4697_s0 = inlined_call_operand.vmem [shape: bf16[8,8,8,16], index: 0, kind: input, shape index: {}]   ;;  %s4698_s3 = inlined_call_operand.vmem [shape: bf16[512,768], index: 3, kind: input, shape index: {}]   ;;  %s4699_s2 = inlined_call_operand.vmem [shape: f32[1,128], index: 2, kind: input, shape index: {}]   ;;  %s4700_s5 = inlined_call_operand.vmem [shape: bf16[768,128], index: 5, kind: input, shape index: {}]   ;;  %s4701_s4 = inlined_call_operand.vmem [shape: f32[1,768], index: 4, kind: input, shape index: {}]   ;;  %s4702_s6 = inlined_call_operand.vmem [shape: f32[1,128], index: 6, kind: input, shape index: {}]   ;;  %s4703_s7 = inlined_call_operand.vmem [shape: f32[8,128], index: 7, kind: output, shape index: {}]  }
   0x1   :  { %v3153_v0 = vld [vmem:[%s4696_s1] sm:$0xff]   ;;  %v2759_v1 = vld [vmem:[%s4697_s0 + $0xc] sm:$0xff]   ;;  %vm615_vm4 = vcmask 1045509   ;;  %vm618_vm5 = vcmask 1046534   ;;  %vm621_vm6 = vcmask 1047559   ;;  %vm717_vm7 = vcmask 1043456  }
   0x2   :  { %v2760_v2 = vld [vmem:[%s4697_s0 + $0x2c] sm:$0xff]   ;;  %3129 = vmatprep.subr.bf16.mxu0 %v3153_v0  ;;  %v36_v7 = vunpack.c.l.bf16 %v2759_v1  ;;  %v61_v10 = vunpack.c.h.bf16 %v2759_v1  ;;  %v85_v33 = vld [vmem:[%s4697_s0] sm:$0xff]   ;;  %vm739_vm8 = vcmask 130048  }
   0x3   :  { %v2761_v3 = vld [vmem:[%s4697_s0 + $0x4c] sm:$0xff]   ;;  %v37_v8 = vunpack.c.l.bf16 %v2760_v2  ;;  %3130 = vmatpush3.bf16.msra.mxu0 %v3153_v0  ;;  %v62_v16 = vunpack.c.h.bf16 %v2760_v2  ;;  %v86_v38 = vld [vmem:[%s4697_s0 + $0x20] sm:$0xff]   ;;  %v93_v57 = vunpack.c.l.bf16 %v85_v33 }
   0x4   :  { %v2762_v4 = vld [vmem:[%s4697_s0 + $0x6c] sm:$0xff]   ;;  %v38_v9 = vunpack.c.l.bf16 %v2761_v3  ;;  %v44_v19 = vmax.f32 %v36_v7, 0.0  ;;  %v63_v27 = vunpack.c.h.bf16 %v2761_v3  ;;  %v69_v34 = vmax.f32 %v61_v10, 0.0  ;;  %v87_v39 = vld [vmem:[%s4697_s0 + $0x40] sm:$0xff]  }
   0x5   :  { %v2763_v5 = vld [vmem:[%s4697_s0 + $0x8c] sm:$0xff]   ;;  %v39_v13 = vunpack.c.l.bf16 %v2762_v4  ;;  %v45_v20 = vmax.f32 %v37_v8, 0.0  ;;  %v64_v28 = vunpack.c.h.bf16 %v2762_v4  ;;  %v70_v35 = vmax.f32 %v62_v16, 0.0  ;;  %v88_v44 = vld [vmem:[%s4697_s0 + $0x60] sm:$0xff]  }
   0x6   :  { %v2764_v6 = vld [vmem:[%s4697_s0 + $0xac] sm:$0xff]   ;;  %v40_v14 = vunpack.c.l.bf16 %v2763_v5  ;;  %v46_v21 = vmax.f32 %v38_v9, 0.0  ;;  %v65_v29 = vunpack.c.h.bf16 %v2763_v5  ;;  %v71_v36 = vmax.f32 %v63_v27, 0.0  ;;  %v89_v45 = vld [vmem:[%s4697_s0 + $0x80] sm:$0xff]  }
   0x7   :  { %v2765_v11 = vld [vmem:[%s4697_s0 + $0xcc] sm:$0xff]   ;;  %v41_v15 = vunpack.c.l.bf16 %v2764_v6  ;;  %v47_v22 = vmax.f32 %v39_v13, 0.0  ;;  %v66_v30 = vunpack.c.h.bf16 %v2764_v6  ;;  %v72_v37 = vmax.f32 %v64_v28, 0.0  ;;  %v90_v50 = vld [vmem:[%s4697_s0 + $0xa0] sm:$0xff]  }
   0x8   :  { %v2766_v12 = vld [vmem:[%s4697_s0 + $0xec] sm:$0xff]   ;;  %v42_v17 = vunpack.c.l.bf16 %v2765_v11  ;;  %v48_v23 = vmax.f32 %v40_v14, 0.0  ;;  %v67_v31 = vunpack.c.h.bf16 %v2765_v11  ;;  %v73_v40 = vmax.f32 %v65_v29, 0.0  ;;  %v91_v51 = vld [vmem:[%s4697_s0 + $0xc0] sm:$0xff]   ;;  %v3632_v29 = vld [vmem:[%s4697_s0 + $0x88] ss:$20 sps:$4 sm:$0xff]  }
   0x9   :  { %v43_v18 = vunpack.c.l.bf16 %v2766_v12  ;;  %v49_v24 = vmax.f32 %v41_v15, 0.0  ;;  %v68_v32 = vunpack.c.h.bf16 %v2766_v12  ;;  %v74_v41 = vmax.f32 %v66_v30, 0.0  ;;  %v92_v52 = vld [vmem:[%s4697_s0 + $0xe0] sm:$0xff]   ;;  %4710 = vst [vmem:[#allocation3_spill] sm:$0xff] %v3632_v29  ;;  %v3637_v30 = vld [vmem:[%s4697_s0 + $0xa8] ss:$20 sps:$4 sm:$0xff]  }
   0xa   :  { %v50_v25 = vmax.f32 %v42_v17, 0.0  ;;  %v75_v42 = vmax.f32 %v67_v31, 0.0  ;;  %v3572_v46 = vadd.f32 %v69_v34, %v44_v19  ;;  %v3574_v47 = vadd.f32 %v70_v35, %v45_v20  ;;  %v3154_v5 = vld [vmem:[%s4698_s3 + $0x4] ss:$24 sps:$4 sm:$0xff]   ;;  %v3159_v15 = vld [vmem:[%s4698_s3] ss:$24 sps:$4 sm:$0xff]  }
   0xb   :  { %v51_v26 = vmax.f32 %v43_v18, 0.0  ;;  %v76_v43 = vmax.f32 %v68_v32, 0.0  ;;  %v3576_v48 = vadd.f32 %v71_v36, %v46_v21  ;;  %v3578_v49 = vadd.f32 %v72_v37, %v47_v22  ;;  %1985 = vmatprep.subr.bf16.mxu1 %v3154_v5  ;;  %v3158_v14 = vld [vmem:[%s4698_s3 + $0xc] ss:$24 sps:$4 sm:$0xff]   ;;  %v3609_v20 = vld [vmem:[%s4697_s0 + $0x8] ss:$20 sps:$4 sm:$0xff]  }
   0xc   :  { %v3589_v53 = vadd.f32 %v73_v40, %v48_v23  ;;  %v3591_v54 = vadd.f32 %v74_v41, %v49_v24  ;;  %v3593_v55 = vadd.f32 %v75_v42, %v50_v25  ;;  %v94_v58 = vunpack.c.l.bf16 %v86_v38  ;;  %v3614_v21 = vld [vmem:[%s4697_s0 + $0x28] ss:$20 sps:$4 sm:$0xff]   ;;  %v3160_v24 = vld [vmem:[%s4698_s3 + $0x34] ss:$24 sps:$4 sm:$0xff]   ;;  %4711 = vst [vmem:[#allocation4_spill] sm:$0xff] %v3637_v30  ;;  %2067 = vmatprep.subr.bf16.mxu0 %v3158_v14 }
   0xd   :  { %v3595_v56 = vadd.f32 %v76_v43, %v51_v26  ;;  %v95_v59 = vunpack.c.l.bf16 %v87_v39  ;;  %v96_v60 = vunpack.c.l.bf16 %v88_v44  ;;  %v97_v61 = vunpack.c.l.bf16 %v89_v45  ;;  %v3619_v22 = vld [vmem:[%s4697_s0 + $0x48] ss:$20 sps:$4 sm:$0xff]   ;;  %1986 = vmatpush1.bf16.msra.mxu1 %v3159_v15 }
   0xe   :  { %v98_v62 = vunpack.c.l.bf16 %v90_v50  ;;  %v99_v63 = vunpack.c.l.bf16 %v91_v51  ;;  %v100_v0 = vunpack.c.l.bf16 %v92_v52  ;;  %v101_v1 = vmax.f32 %v93_v57, 0.0  ;;  %v3624_v23 = vld [vmem:[%s4697_s0 + $0x68] ss:$20 sps:$4 sm:$0xff]   ;;  %1987 = vmatprep.subr.bf16.mxu1 %v3160_v24 }
   0xf   :  { %v102_v2 = vmax.f32 %v94_v58, 0.0  ;;  %v103_v3 = vmax.f32 %v95_v59, 0.0  ;;  %v104_v4 = vmax.f32 %v96_v60, 0.0  ;;  %v105_v6 = vmax.f32 %v97_v61, 0.0  ;;  %4709 = vst [vmem:[#allocation2_spill] sm:$0xff] %v3624_v23 }
  0x10   :  { %v106_v7 = vmax.f32 %v98_v62, 0.0  ;;  %v107_v8 = vmax.f32 %v99_v63, 0.0  ;;  %v108_v9 = vmax.f32 %v100_v0, 0.0  ;;  %v118_v10 = vunpack.c.h.bf16 %v85_v33  ;;  %v3642_v35 = vld [vmem:[%s4697_s0 + $0xc8] ss:$20 sps:$4 sm:$0xff]  }
  0x11   :  { %v119_v11 = vunpack.c.h.bf16 %v86_v38  ;;  %v120_v12 = vunpack.c.h.bf16 %v87_v39  ;;  %v121_v13 = vunpack.c.h.bf16 %v88_v44  ;;  %v122_v16 = vunpack.c.h.bf16 %v89_v45  ;;  %4712 = vst [vmem:[#allocation5_spill] sm:$0xff] %v3642_v35  ;;  %v3647_v40 = vld [vmem:[%s4697_s0 + $0xe8] ss:$20 sps:$4 sm:$0xff]   ;;  %v3171_v63 = vld [vmem:[%s4698_s3 + $0x60] ss:$24 sps:$4 sm:$0xff]  }
  0x12   :  { %v123_v17 = vunpack.c.h.bf16 %v90_v50  ;;  %v124_v18 = vunpack.c.h.bf16 %v91_v51  ;;  %v125_v19 = vunpack.c.h.bf16 %v92_v52  ;;  %v126_v25 = vmax.f32 %v118_v10, 0.0  ;;  %4713 = vst [vmem:[#allocation6_spill] sm:$0xff] %v3647_v40  ;;  %v3165_v41 = vld [vmem:[%s4698_s3 + $0x30] ss:$24 sps:$4 sm:$0xff]   ;;  %v3166_v50 = vld [vmem:[%s4698_s3 + $0x64] ss:$24 sps:$4 sm:$0xff]  }
  0x13   :  { %v127_v26 = vmax.f32 %v119_v11, 0.0  ;;  %v128_v27 = vmax.f32 %v120_v12, 0.0  ;;  %v129_v28 = vmax.f32 %v121_v13, 0.0  ;;  %v130_v31 = vmax.f32 %v122_v16, 0.0  ;;  %1988 = vmatpush1.bf16.msra.mxu1 %v3165_v41  ;;  %v3677_v10 = vld [vmem:[%s4697_s0 + $0x34] sm:$0xff]  }
  0x14   :  { %v131_v32 = vmax.f32 %v123_v17, 0.0  ;;  %v132_v33 = vmax.f32 %v124_v18, 0.0  ;;  %v133_v34 = vmax.f32 %v125_v19, 0.0  ;;  %v134_v36 = vadd.f32 %v126_v25, %v101_v1  ;;  %1989 = vmatprep.subr.bf16.mxu1 %v3166_v50  ;;  %v3682_v11 = vld [vmem:[%s4697_s0 + $0x54] sm:$0xff]   ;;  %v3177_v24 = vld [vmem:[%s4698_s3 + $0x90] ss:$24 sps:$4 sm:$0xff]  }
  0x15   :  { %v135_v37 = vadd.f32 %v127_v26, %v102_v2  ;;  %v136_v38 = vadd.f32 %v128_v27, %v103_v3  ;;  %v137_v39 = vadd.f32 %v129_v28, %v104_v4  ;;  %v138_v42 = vadd.f32 %v130_v31, %v105_v6  ;;  %v3172_v4 = vld [vmem:[%s4698_s3 + $0x94] ss:$24 sps:$4 sm:$0xff]   ;;  %v3178_v31 = vld [vmem:[%s4698_s3 + $0xc4] ss:$24 sps:$4 sm:$0xff]  }
  0x16   :  { %v139_v43 = vadd.f32 %v131_v32, %v106_v7  ;;  %v140_v44 = vadd.f32 %v132_v33, %v107_v8  ;;  %v141_v45 = vadd.f32 %v133_v34, %v108_v9  ;;  %v151_v51 = vunpack.c.l.bf16 %v3609_v20  ;;  %v3672_v9 = vld [vmem:[%s4697_s0 + $0x14] sm:$0xff]  }
  0x17   :  { %v152_v52 = vunpack.c.l.bf16 %v3614_v21  ;;  %v153_v57 = vunpack.c.l.bf16 %v3619_v22  ;;  %v154_v58 = vunpack.c.l.bf16 %v3624_v23  ;;  %v155_v59 = vunpack.c.l.bf16 %v3632_v29  ;;  %v3687_v12 = vld [vmem:[%s4697_s0 + $0x74] sm:$0xff]   ;;  %1990 = vmatpush1.bf16.msra.mxu1 %v3171_v63  ;;  %v3214_v29 = vld [vmem:[%s4698_s3 + $0x1e4] ss:$24 sps:$4 sm:$0xff]  }
  0x18   :  { %v156_v60 = vunpack.c.l.bf16 %v3637_v30  ;;  %v157_v61 = vunpack.c.l.bf16 %v3642_v35  ;;  %v158_v62 = vunpack.c.l.bf16 %v3647_v40  ;;  %v159_v0 = vmax.f32 %v151_v51, 0.0  ;;  %v3692_v17 = vld [vmem:[%s4697_s0 + $0x94] sm:$0xff]   ;;  %1991 = vmatprep.subr.bf16.mxu1 %v3172_v4 }
  0x19   :  { %v160_v1 = vmax.f32 %v152_v52, 0.0  ;;  %v161_v2 = vmax.f32 %v153_v57, 0.0  ;;  %v162_v3 = vmax.f32 %v154_v58, 0.0  ;;  %v163_v5 = vmax.f32 %v155_v59, 0.0  ;;  %v3697_v18 = vld [vmem:[%s4697_s0 + $0xb4] sm:$0xff]  }
  0x1a   :  { %v164_v6 = vmax.f32 %v156_v60, 0.0  ;;  %v165_v7 = vmax.f32 %v157_v61, 0.0  ;;  %v166_v8 = vmax.f32 %v158_v62, 0.0  ;;  %v167_v13 = vadd.f32 %v159_v0, %v134_v36  ;;  %v3702_v19 = vld [vmem:[%s4697_s0 + $0xd4] sm:$0xff]  }
  0x1b   :  { %v168_v14 = vadd.f32 %v160_v1, %v135_v37  ;;  %v169_v15 = vadd.f32 %v161_v2, %v136_v38  ;;  %v170_v16 = vadd.f32 %v162_v3, %v137_v39  ;;  %v171_v25 = vadd.f32 %v163_v5, %v138_v42  ;;  %v3725_v37 = vld [vmem:[%s4697_s0 + $0xf4] sm:$0xff]   ;;  %1992 = vmatpush1.bf16.msra.mxu1 %v3177_v24 }
  0x1c   :  { %v172_v26 = vadd.f32 %v164_v6, %v139_v43  ;;  %v173_v27 = vadd.f32 %v165_v7, %v140_v44  ;;  %v174_v28 = vadd.f32 %v166_v8, %v141_v45  ;;  %v3711_v32 = vadd.f32 %v167_v13, %v3572_v46  ;;  %v3183_v51 = vld [vmem:[%s4698_s3 + $0xc0] ss:$24 sps:$4 sm:$0xff]   ;;  %1993 = vmatprep.subr.bf16.mxu1 %v3178_v31  ;;  %v3184_v60 = vld [vmem:[%s4698_s3 + $0xf4] ss:$24 sps:$4 sm:$0xff]   ;;  %v3189_v13 = vld [vmem:[%s4698_s3 + $0xf0] ss:$24 sps:$4 sm:$0xff]  }
  0x1d   :  { %v3714_v33 = vadd.f32 %v168_v14, %v3574_v47  ;;  %v3717_v34 = vadd.f32 %v169_v15, %v3576_v48  ;;  %v3720_v36 = vadd.f32 %v170_v16, %v3578_v49  ;;  %v3728_v38 = vadd.f32 %v171_v25, %v3589_v53 }
  0x1e   :  { %v3731_v39 = vadd.f32 %v172_v26, %v3591_v54  ;;  %v3734_v41 = vadd.f32 %v173_v27, %v3593_v55  ;;  %v3737_v42 = vadd.f32 %v174_v28, %v3595_v56  ;;  %v192_v43 = vunpack.c.l.bf16 %v3672_v9 }
  0x1f   :  { %v193_v44 = vunpack.c.l.bf16 %v3677_v10  ;;  %v194_v45 = vunpack.c.l.bf16 %v3682_v11  ;;  %v195_v50 = vunpack.c.l.bf16 %v3687_v12  ;;  %v196_v52 = vunpack.c.l.bf16 %v3692_v17  ;;  %1994 = vmatpush1.bf16.msra.mxu1 %v3183_v51 }
  0x20   :  { %v197_v57 = vunpack.c.l.bf16 %v3697_v18  ;;  %v198_v58 = vunpack.c.l.bf16 %v3702_v19  ;;  %v199_v59 = vunpack.c.l.bf16 %v3725_v37  ;;  %v200_v61 = vmax.f32 %v192_v43, 0.0  ;;  %1995 = vmatprep.subr.bf16.mxu1 %v3184_v60  ;;  %v3195_v43 = vld [vmem:[%s4698_s3 + $0x120] ss:$24 sps:$4 sm:$0xff]  }
  0x21   :  { %v201_v62 = vmax.f32 %v193_v44, 0.0  ;;  %v202_v63 = vmax.f32 %v194_v45, 0.0  ;;  %v203_v0 = vmax.f32 %v195_v50, 0.0  ;;  %v204_v1 = vmax.f32 %v196_v52, 0.0  ;;  %v3196_v52 = vld [vmem:[%s4698_s3 + $0x154] ss:$24 sps:$4 sm:$0xff]  }
  0x22   :  { %v205_v2 = vmax.f32 %v197_v57, 0.0  ;;  %v206_v3 = vmax.f32 %v198_v58, 0.0  ;;  %v207_v4 = vmax.f32 %v199_v59, 0.0  ;;  %v3754_v5 = vadd.f32 %v200_v61, %v3572_v46 }
  0x23   :  { %v3757_v6 = vadd.f32 %v201_v62, %v3574_v47  ;;  %v3760_v7 = vadd.f32 %v202_v63, %v3576_v48  ;;  %v3763_v8 = vadd.f32 %v203_v0, %v3578_v49  ;;  %v3769_v14 = vadd.f32 %v204_v1, %v3589_v53  ;;  %v3190_v49 = vld [vmem:[%s4698_s3 + $0x124] ss:$24 sps:$4 sm:$0xff]   ;;  %1996 = vmatpush1.bf16.msra.mxu1 %v3189_v13  ;;  %v3201_v13 = vld [vmem:[%s4698_s3 + $0x150] ss:$24 sps:$4 sm:$0xff]  }
  0x24   :  { %v3772_v46 = vadd.f32 %v205_v2, %v3591_v54  ;;  %v3775_v47 = vadd.f32 %v206_v3, %v3593_v55  ;;  %v3778_v48 = vadd.f32 %v207_v4, %v3595_v56  ;;  %v290_v15 = vrot.slane %v3711_v32, 1  ;;  %1997 = vmatprep.subr.bf16.mxu1 %v3190_v49 }
  0x25   :  { %v291_v16 = vrot.slane %v3714_v33, 1  ;;  %v292_v53 = vrot.slane %v3717_v34, 1  ;;  %v293_v54 = vrot.slane %v3720_v36, 1  ;;  %v294_v24 = vrot.slane %v3728_v38, 1 }
  0x26   :  { %v295_v55 = vrot.slane %v3731_v39, 1  ;;  %v296_v56 = vrot.slane %v3734_v41, 1  ;;  %v297_v25 = vrot.slane %v3737_v42, 1  ;;  %v306_v26 = vadd.f32 %v290_v15, %v3711_v32 }
  0x27   :  { %v307_v27 = vadd.f32 %v291_v16, %v3714_v33  ;;  %v308_v28 = vadd.f32 %v292_v53, %v3717_v34  ;;  %v309_v31 = vadd.f32 %v293_v54, %v3720_v36  ;;  %v310_v44 = vadd.f32 %v294_v24, %v3728_v38  ;;  %1998 = vmatpush1.bf16.msra.mxu1 %v3195_v43  ;;  %v3202_v54 = vld [vmem:[%s4698_s3 + $0x184] ss:$24 sps:$4 sm:$0xff]  }
  0x28   :  { %v311_v45 = vadd.f32 %v295_v55, %v3731_v39  ;;  %v312_v50 = vadd.f32 %v296_v56, %v3734_v41  ;;  %v313_v51 = vadd.f32 %v297_v25, %v3737_v42  ;;  %v314_v57 = vrot.slane %v3711_v32, 2  ;;  %1999 = vmatprep.subr.bf16.mxu1 %v3196_v52 }
  0x29   :  { %v315_v58 = vrot.slane %v3714_v33, 2  ;;  %v316_v59 = vrot.slane %v3717_v34, 2  ;;  %v317_v60 = vrot.slane %v3720_v36, 2  ;;  %v318_v61 = vrot.slane %v3728_v38, 2 }
  0x2a   :  { %v319_v62 = vrot.slane %v3731_v39, 2  ;;  %v320_v63 = vrot.slane %v3734_v41, 2  ;;  %v321_v0 = vrot.slane %v3737_v42, 2  ;;  %v330_v1 = vadd.f32 %v314_v57, %v306_v26 }
  0x2b   :  { %v331_v2 = vadd.f32 %v315_v58, %v307_v27  ;;  %v332_v3 = vadd.f32 %v316_v59, %v308_v28  ;;  %v333_v4 = vadd.f32 %v317_v60, %v309_v31  ;;  %v334_v49 = vadd.f32 %v318_v61, %v310_v44  ;;  %2000 = vmatpush1.bf16.msra.mxu1 %v3201_v13 }
  0x2c   :  { %v335_v15 = vadd.f32 %v319_v62, %v311_v45  ;;  %v336_v16 = vadd.f32 %v320_v63, %v312_v50  ;;  %v337_v53 = vadd.f32 %v321_v0, %v313_v51  ;;  %v346_v24 = vrot.slane %v306_v26, 3  ;;  %v3207_v26 = vld [vmem:[%s4698_s3 + $0x180] ss:$24 sps:$4 sm:$0xff]   ;;  %2001 = vmatprep.subr.bf16.mxu1 %v3202_v54 }
  0x2d   :  { %v347_v55 = vrot.slane %v307_v27, 3  ;;  %v348_v56 = vrot.slane %v308_v28, 3  ;;  %v349_v25 = vrot.slane %v309_v31, 3  ;;  %v350_v57 = vrot.slane %v310_v44, 3 }
  0x2e   :  { %v351_v58 = vrot.slane %v311_v45, 3  ;;  %v352_v43 = vrot.slane %v312_v50, 3  ;;  %v353_v59 = vrot.slane %v313_v51, 3  ;;  %v3819_v60 = vadd.f32 %v346_v24, %v330_v1  ;;  %v3208_v45 = vld [vmem:[%s4698_s3 + $0x1b4] ss:$24 sps:$4 sm:$0xff]  }
  0x2f   :  { %v3821_v40 = vadd.f32 %v347_v55, %v331_v2  ;;  %v3823_v61 = vadd.f32 %v348_v56, %v332_v3  ;;  %v3825_v62 = vadd.f32 %v349_v25, %v333_v4  ;;  %v3830_v27 = vadd.f32 %v350_v57, %v334_v49  ;;  %2002 = vmatpush1.bf16.msra.mxu1 %v3207_v26 }
  0x30   :  { %v3832_v28 = vadd.f32 %v351_v58, %v335_v15  ;;  %v3834_v31 = vadd.f32 %v352_v43, %v336_v16  ;;  %v3836_v44 = vadd.f32 %v353_v59, %v337_v53  ;;  %v370_v50 = vrot.slane %v3711_v32, 3  ;;  %v3213_v58 = vld [vmem:[%s4698_s3 + $0x1b0] ss:$24 sps:$4 sm:$0xff]   ;;  %2003 = vmatprep.subr.bf16.mxu1 %v3208_v45 }
  0x31   :  { %v371_v51 = vrot.slane %v3714_v33, 3  ;;  %v372_v52 = vrot.slane %v3717_v34, 3  ;;  %v373_v63 = vrot.slane %v3720_v36, 3  ;;  %v374_v0 = vrot.slane %v3728_v38, 3 }
  0x32   :  { %v375_v13 = vrot.slane %v3731_v39, 3  ;;  %v376_v24 = vrot.slane %v3734_v41, 3  ;;  %v377_v54 = vrot.slane %v3737_v42, 3  ;;  %v386_v55 = vadd.f32 %v370_v50, %v330_v1 }
  0x33   :  { %v387_v56 = vadd.f32 %v371_v51, %v331_v2  ;;  %v388_v25 = vadd.f32 %v372_v52, %v332_v3  ;;  %v389_v57 = vadd.f32 %v373_v63, %v333_v4  ;;  %v390_v43 = vadd.f32 %v374_v0, %v334_v49  ;;  %2004 = vmatpush1.bf16.msra.mxu1 %v3213_v58 }
  0x34   :  { %v391_v59 = vadd.f32 %v375_v13, %v335_v15  ;;  %v392_v35 = vadd.f32 %v376_v24, %v336_v16  ;;  %v393_v30 = vadd.f32 %v377_v54, %v337_v53  ;;  %v394_v23 = vrot.slane %v3711_v32, 4  ;;  %v3219_v32 = vld [vmem:[%s4698_s3 + $0x1e0] ss:$24 sps:$4 sm:$0xff]   ;;  %2005 = vmatprep.subr.bf16.mxu1 %v3214_v29 }
  0x35   :  { %v395_v1 = vrot.slane %v3714_v33, 4  ;;  %v396_v2 = vrot.slane %v3717_v34, 4  ;;  %v397_v3 = vrot.slane %v3720_v36, 4  ;;  %v398_v4 = vrot.slane %v3728_v38, 4 }
  0x36   :  { %v399_v49 = vrot.slane %v3731_v39, 4  ;;  %v400_v15 = vrot.slane %v3734_v41, 4  ;;  %v401_v16 = vrot.slane %v3737_v42, 4  ;;  %v410_v53 = vadd.f32 %v394_v23, %v386_v55  ;;  %v3220_v39 = vld [vmem:[%s4698_s3 + $0x214] ss:$24 sps:$4 sm:$0xff]  }
  0x37   :  { %v411_v26 = vadd.f32 %v395_v1, %v387_v56  ;;  %v412_v45 = vadd.f32 %v396_v2, %v388_v25  ;;  %v413_v50 = vadd.f32 %v397_v3, %v389_v57  ;;  %v414_v33 = vadd.f32 %v398_v4, %v390_v43  ;;  %2006 = vmatpush1.bf16.msra.mxu1 %v3219_v32  ;;  %v3231_v56 = vld [vmem:[%s4698_s3 + $0x240] ss:$24 sps:$4 sm:$0xff]  }
  0x38   :  { %v415_v34 = vadd.f32 %v399_v49, %v391_v59  ;;  %v416_v36 = vadd.f32 %v400_v15, %v392_v35  ;;  %v417_v38 = vadd.f32 %v401_v16, %v393_v30  ;;  %v554_v23 = vpack.c.bf16 %v3819_v60, %v3819_v60  ;;  %2007 = vmatprep.subr.bf16.mxu1 %v3220_v39  ;;  %v3232_v59 = vld [vmem:[%s4698_s3 + $0x274] ss:$24 sps:$4 sm:$0xff]  }
  0x39   :  { %v555_v41 = vpack.c.bf16 %v3821_v40, %v3821_v40  ;;  %v556_v42 = vpack.c.bf16 %v3823_v61, %v3823_v61  ;;  %v557_v51 = vpack.c.bf16 %v3825_v62, %v3825_v62  ;;  %v558_v29 = vpack.c.bf16 %v3830_v27, %v3830_v27  ;;  %v3225_v62 = vld [vmem:[%s4698_s3 + $0x210] ss:$24 sps:$4 sm:$0xff]  }
  0x3a   :  { %v559_v30 = vpack.c.bf16 %v3832_v28, %v3832_v28  ;;  %v560_v35 = vpack.c.bf16 %v3834_v31, %v3834_v31  ;;  %v561_v60 = vpack.c.bf16 %v3836_v44, %v3836_v44  ;;  %v562_v40 = vpack.c.bf16 %v410_v53, %v410_v53  ;;  %v3226_v31 = vld [vmem:[%s4698_s3 + $0x244] ss:$24 sps:$4 sm:$0xff]  }
  0x3b   :  { %v563_v52 = vpack.c.bf16 %v411_v26, %v411_v26  ;;  %v564_v61 = vpack.c.bf16 %v412_v45, %v412_v45  ;;  %v565_v63 = vpack.c.bf16 %v413_v50, %v413_v50  ;;  %v566_v27 = vpack.c.bf16 %v414_v33, %v414_v33  ;;  %2008 = vmatpush1.bf16.msra.mxu1 %v3225_v62  ;;  %v3237_v33 = vld [vmem:[%s4698_s3 + $0x270] ss:$24 sps:$4 sm:$0xff]  }
  0x3c   :  { %v567_v0 = vpack.c.bf16 %v415_v34, %v415_v34  ;;  %v568_v28 = vpack.c.bf16 %v416_v36, %v416_v36  ;;  %v569_v13 = vpack.c.bf16 %v417_v38, %v417_v38  ;;  %v594_v44 = vunpack.c.l.b16 %v554_v23  ;;  %2009 = vmatprep.subr.bf16.mxu1 %v3226_v31 }
  0x3d   :  { %v595_v24 = vunpack.c.l.b16 %v555_v41  ;;  %v596_v54 = vunpack.c.l.b16 %v556_v42  ;;  %v597_v55 = vunpack.c.l.b16 %v557_v51  ;;  %v598_v25 = vunpack.c.l.b16 %v558_v29 }
  0x3e   :  { %v599_v57 = vunpack.c.l.b16 %v559_v30  ;;  %v600_v58 = vunpack.c.l.b16 %v560_v35  ;;  %v601_v43 = vunpack.c.l.b16 %v561_v60  ;;  %v632_v4 = vunpack.c.l.b16 %v562_v40 }
  0x3f   :  { %v602_v1 = vrot.slane %v595_v24, 7  ;;  %v605_v2 = vrot.slane %v596_v54, 6  ;;  %v608_v3 = vrot.slane %v597_v55, 5  ;;  %v611_v49 = vrot.slane %v598_v25, 4  ;;  %2010 = vmatpush1.bf16.msra.mxu1 %v3231_v56 }
  0x40   :  { %v614_v15 = vrot.slane %v599_v57, 3  ;;  %v617_v16 = vrot.slane %v600_v58, 2  ;;  %v620_v53 = vrot.slane %v601_v43, 1  ;;  %v633_v45 = vunpack.c.l.b16 %v563_v52  ;;  %2011 = vmatprep.subr.bf16.mxu1 %v3232_v59 }
  0x41   :  { %v604_v26 = vsel %vm603_vm0, %v602_v1, %v594_v44  ;;  %v634_v50 = vunpack.c.l.b16 %v564_v61  ;;  %v635_v32 = vunpack.c.l.b16 %v565_v63  ;;  %v636_v36 = vunpack.c.l.b16 %v566_v27 }
  0x42   :  { %v607_v34 = vsel %vm606_vm1, %v605_v2, %v604_v26  ;;  %v637_v38 = vunpack.c.l.b16 %v567_v0  ;;  %v638_v39 = vunpack.c.l.b16 %v568_v28  ;;  %v639_v41 = vunpack.c.l.b16 %v569_v13 }
  0x43   :  { %v610_v23 = vsel %vm609_vm2, %v608_v3, %v607_v34  ;;  %v640_v42 = vrot.slane %v632_v4, 3  ;;  %v641_v51 = vrot.slane %v633_v45, 2  ;;  %v643_v30 = vrot.slane %v634_v50, 1  ;;  %2012 = vmatpush1.bf16.msra.mxu1 %v3237_v33  ;;  %v4715_v33 = vld [vmem:[#allocation3_spill] sm:$0xff]  ;;  %v4716_v34 = vld [vmem:[#allocation4_spill] sm:$0xff] }
  0x44   :  { %v613_v29 = vsel %vm612_vm3, %v611_v49, %v610_v23  ;;  %v646_v35 = vrot.slane %v636_v36, 7  ;;  %v648_v60 = vrot.slane %v637_v38, 6  ;;  %v650_v61 = vrot.slane %v638_v39, 5  ;;  %v4717_v38 = vld [vmem:[#allocation5_spill] sm:$0xff]  ;;  %v4718_v39 = vld [vmem:[#allocation6_spill] sm:$0xff] }
  0x45   :  { %v616_v40 = vsel %vm615_vm4, %v614_v15, %v613_v29  ;;  %v642_v52 = vsel %vm603_vm0, %v641_v51, %v640_v42  ;;  %v652_v63 = vrot.slane %v639_v41, 4  ;;  %v225_v0 = vunpack.c.h.bf16 %v3672_v9 }
  0x46   :  { %v619_v62 = vsel %vm618_vm5, %v617_v16, %v616_v40  ;;  %v644_v27 = vsel %vm606_vm1, %v643_v30, %v642_v52  ;;  %v226_v31 = vunpack.c.h.bf16 %v3677_v10  ;;  %v227_v44 = vunpack.c.h.bf16 %v3682_v11 }
  0x47   :  { %v622_v28 = vsel %vm621_vm6, %v620_v53, %v619_v62  ;;  %v645_v13 = vsel %vm609_vm2, %v635_v32, %v644_v27  ;;  %v228_v55 = vunpack.c.h.bf16 %v3687_v12  ;;  %v229_v56 = vunpack.c.h.bf16 %v3692_v17  ;;  %v4714_v32 = vld [vmem:[#allocation2_spill] sm:$0xff] }
  0x48   :  { %v623_v24 = vpack.c.b16 %v622_v28, %v622_v28  ;;  %v647_v54 = vsel %vm612_vm3, %v646_v35, %v645_v13  ;;  %v230_v9 = vunpack.c.h.bf16 %v3697_v18  ;;  %v231_v57 = vunpack.c.h.bf16 %v3702_v19 }
  0x49   :  { %v649_v25 = vsel %vm615_vm4, %v648_v60, %v647_v54  ;;  %v232_v58 = vunpack.c.h.bf16 %v3725_v37  ;;  %v233_v43 = vmax.f32 %v225_v0, 0.0  ;;  %v234_v11 = vmax.f32 %v226_v31, 0.0 }
  0x4a   :  { %v651_v10 = vsel %vm618_vm5, %v650_v61, %v649_v25  ;;  %v235_v59 = vmax.f32 %v227_v44, 0.0  ;;  %v236_v2 = vmax.f32 %v228_v55, 0.0  ;;  %v237_v3 = vmax.f32 %v229_v56, 0.0 }
  0x4b   :  { %v653_v1 = vsel %vm621_vm6, %v652_v63, %v651_v10  ;;  %v238_v12 = vmax.f32 %v230_v9, 0.0  ;;  %v239_v17 = vmax.f32 %v231_v57, 0.0  ;;  %v240_v49 = vmax.f32 %v232_v58, 0.0 }
  0x4c   :  { %v654_v4 = vpack.c.b16 %v653_v1, %v653_v1  ;;  %v241_v15 = vadd.f32 %v233_v43, %v3754_v5  ;;  %v242_v18 = vadd.f32 %v234_v11, %v3757_v6  ;;  %v243_v19 = vadd.f32 %v235_v59, %v3760_v7 }
  0x4d   :  { %v244_v37 = vadd.f32 %v236_v2, %v3763_v8  ;;  %v245_v16 = vadd.f32 %v237_v3, %v3769_v14  ;;  %v246_v26 = vadd.f32 %v238_v12, %v3772_v46  ;;  %v247_v45 = vadd.f32 %v239_v17, %v3775_v47 }
  0x4e   :  { %v720_v53 = vsel %vm717_vm7, %v623_v24, %v654_v4  ;;  %v248_v50 = vadd.f32 %v240_v49, %v3778_v48  ;;  %v258_v5 = vunpack.c.h.bf16 %v3609_v20  ;;  %v259_v6 = vunpack.c.h.bf16 %v3614_v21 }
  0x4f   :  { %3131 = vmatprep.mubr.msk.bf16.mxu0 %vm739_vm8, %v720_v53  ;;  %v260_v7 = vunpack.c.h.bf16 %v3619_v22  ;;  %v261_v8 = vunpack.c.h.bf16 %v4714_v32  ;;  %v262_v14 = vunpack.c.h.bf16 %v4715_v33  ;;  %v263_v36 = vunpack.c.h.bf16 %v4716_v34 }
  0x50   :  { %v264_v46 = vunpack.c.h.bf16 %v4717_v38  ;;  %v265_v47 = vunpack.c.h.bf16 %v4718_v39  ;;  %v266_v23 = vmax.f32 %v258_v5, 0.0  ;;  %v267_v48 = vmax.f32 %v259_v6, 0.0 }
  0x51   :  { %v268_v41 = vmax.f32 %v260_v7, 0.0  ;;  %v269_v42 = vmax.f32 %v261_v8, 0.0  ;;  %v270_v51 = vmax.f32 %v262_v14, 0.0  ;;  %v271_v20 = vmax.f32 %v263_v36, 0.0 }
  0x52   :  { %v272_v29 = vmax.f32 %v264_v46, 0.0  ;;  %v273_v21 = vmax.f32 %v265_v47, 0.0  ;;  %v3940_v30 = vadd.f32 %v266_v23, %v241_v15  ;;  %v3942_v22 = vadd.f32 %v267_v48, %v242_v18 }
  0x53   :  { %v3944_v35 = vadd.f32 %v268_v41, %v243_v19  ;;  %v3946_v60 = vadd.f32 %v269_v42, %v244_v37  ;;  %v3948_v40 = vadd.f32 %v270_v51, %v245_v16  ;;  %v3950_v52 = vadd.f32 %v271_v20, %v246_v26 }
  0x54   :  { %v3952_v61 = vadd.f32 %v272_v29, %v247_v45  ;;  %v3954_v63 = vadd.f32 %v273_v21, %v248_v50  ;;  %v426_v62 = vrot.slane %v3940_v30, 1  ;;  %v427_v27 = vrot.slane %v3942_v22, 1 }
  0x55   :  { %v428_v0 = vrot.slane %v3944_v35, 1  ;;  %v429_v28 = vrot.slane %v3946_v60, 1  ;;  %v430_v13 = vrot.slane %v3948_v40, 1  ;;  %v431_v31 = vrot.slane %v3950_v52, 1 }
  0x56   :  { %v432_v44 = vrot.slane %v3952_v61, 1  ;;  %v433_v24 = vrot.slane %v3954_v63, 1  ;;  %v442_v54 = vadd.f32 %v426_v62, %v3940_v30  ;;  %v443_v55 = vadd.f32 %v427_v27, %v3942_v22 }
  0x57   :  { %v444_v56 = vadd.f32 %v428_v0, %v3944_v35  ;;  %v445_v25 = vadd.f32 %v429_v28, %v3946_v60  ;;  %v446_v9 = vadd.f32 %v430_v13, %v3948_v40  ;;  %v447_v57 = vadd.f32 %v431_v31, %v3950_v52 }
  0x58   :  { %v448_v58 = vadd.f32 %v432_v44, %v3952_v61  ;;  %v449_v10 = vadd.f32 %v433_v24, %v3954_v63  ;;  %v450_v43 = vrot.slane %v3940_v30, 2  ;;  %v451_v11 = vrot.slane %v3942_v22, 2 }
  0x59   :  { %v452_v59 = vrot.slane %v3944_v35, 2  ;;  %v453_v1 = vrot.slane %v3946_v60, 2  ;;  %v454_v2 = vrot.slane %v3948_v40, 2  ;;  %v455_v3 = vrot.slane %v3950_v52, 2 }
  0x5a   :  { %v456_v12 = vrot.slane %v3952_v61, 2  ;;  %v457_v4 = vrot.slane %v3954_v63, 2  ;;  %v466_v17 = vadd.f32 %v450_v43, %v442_v54  ;;  %v467_v49 = vadd.f32 %v451_v11, %v443_v55 }
  0x5b   :  { %v468_v15 = vadd.f32 %v452_v59, %v444_v56  ;;  %v469_v18 = vadd.f32 %v453_v1, %v445_v25  ;;  %v470_v19 = vadd.f32 %v454_v2, %v446_v9  ;;  %v471_v37 = vadd.f32 %v455_v3, %v447_v57 }
  0x5c   :  { %v472_v16 = vadd.f32 %v456_v12, %v448_v58  ;;  %v473_v53 = vadd.f32 %v457_v4, %v449_v10  ;;  %v482_v26 = vrot.slane %v442_v54, 3  ;;  %v483_v45 = vrot.slane %v443_v55, 3 }
  0x5d   :  { %v484_v50 = vrot.slane %v444_v56, 3  ;;  %v485_v5 = vrot.slane %v445_v25, 3  ;;  %v486_v6 = vrot.slane %v446_v9, 3  ;;  %v487_v7 = vrot.slane %v447_v57, 3 }
  0x5e   :  { %v488_v32 = vrot.slane %v448_v58, 3  ;;  %v489_v8 = vrot.slane %v449_v10, 3  ;;  %v498_v33 = vadd.f32 %v482_v26, %v466_v17  ;;  %v499_v14 = vadd.f32 %v483_v45, %v467_v49 }
  0x5f   :  { %v500_v34 = vadd.f32 %v484_v50, %v468_v15  ;;  %v501_v36 = vadd.f32 %v485_v5, %v469_v18  ;;  %v502_v38 = vadd.f32 %v486_v6, %v470_v19  ;;  %v503_v46 = vadd.f32 %v487_v7, %v471_v37 }
  0x60   :  { %v504_v39 = vadd.f32 %v488_v32, %v472_v16  ;;  %v505_v47 = vadd.f32 %v489_v8, %v473_v53  ;;  %v506_v23 = vrot.slane %v3940_v30, 3  ;;  %v507_v48 = vrot.slane %v3942_v22, 3 }
  0x61   :  { %v508_v41 = vrot.slane %v3944_v35, 3  ;;  %v509_v42 = vrot.slane %v3946_v60, 3  ;;  %v510_v51 = vrot.slane %v3948_v40, 3  ;;  %v511_v20 = vrot.slane %v3950_v52, 3 }
  0x62   :  { %v512_v29 = vrot.slane %v3952_v61, 3  ;;  %v513_v21 = vrot.slane %v3954_v63, 3  ;;  %v522_v62 = vadd.f32 %v506_v23, %v466_v17  ;;  %v523_v27 = vadd.f32 %v507_v48, %v467_v49 }
  0x63   :  { %v524_v0 = vadd.f32 %v508_v41, %v468_v15  ;;  %v525_v28 = vadd.f32 %v509_v42, %v469_v18  ;;  %v526_v13 = vadd.f32 %v510_v51, %v470_v19  ;;  %v527_v31 = vadd.f32 %v511_v20, %v471_v37 }
  0x64   :  { %v528_v44 = vadd.f32 %v512_v29, %v472_v16  ;;  %v529_v24 = vadd.f32 %v513_v21, %v473_v53  ;;  %v530_v54 = vrot.slane %v3940_v30, 4  ;;  %v531_v55 = vrot.slane %v3942_v22, 4 }
  0x65   :  { %v532_v56 = vrot.slane %v3944_v35, 4  ;;  %v533_v25 = vrot.slane %v3946_v60, 4  ;;  %v534_v9 = vrot.slane %v3948_v40, 4  ;;  %v535_v57 = vrot.slane %v3950_v52, 4 }
  0x66   :  { %v536_v58 = vrot.slane %v3952_v61, 4  ;;  %v537_v10 = vrot.slane %v3954_v63, 4  ;;  %v546_v43 = vadd.f32 %v530_v54, %v522_v62  ;;  %v547_v11 = vadd.f32 %v531_v55, %v523_v27 }
  0x67   :  { %v548_v59 = vadd.f32 %v532_v56, %v524_v0  ;;  %v549_v1 = vadd.f32 %v533_v25, %v525_v28  ;;  %v550_v2 = vadd.f32 %v534_v9, %v526_v13  ;;  %v551_v30 = vadd.f32 %v535_v57, %v527_v31 }
  0x68   :  { %v552_v3 = vadd.f32 %v536_v58, %v528_v44  ;;  %v553_v22 = vadd.f32 %v537_v10, %v529_v24  ;;  %v570_v12 = vpack.c.bf16 %v498_v33, %v498_v33  ;;  %v571_v35 = vpack.c.bf16 %v499_v14, %v499_v14 }
  0x69   :  { %v572_v4 = vpack.c.bf16 %v500_v34, %v500_v34  ;;  %v573_v60 = vpack.c.bf16 %v501_v36, %v501_v36  ;;  %v574_v17 = vpack.c.bf16 %v502_v38, %v502_v38  ;;  %v575_v40 = vpack.c.bf16 %v503_v46, %v503_v46 }
  0x6a   :  { %v576_v49 = vpack.c.bf16 %v504_v39, %v504_v39  ;;  %v577_v52 = vpack.c.bf16 %v505_v47, %v505_v47  ;;  %v578_v15 = vpack.c.bf16 %v546_v43, %v546_v43  ;;  %v579_v61 = vpack.c.bf16 %v547_v11, %v547_v11 }
  0x6b   :  { %v580_v18 = vpack.c.bf16 %v548_v59, %v548_v59  ;;  %v581_v63 = vpack.c.bf16 %v549_v1, %v549_v1  ;;  %v582_v19 = vpack.c.bf16 %v550_v2, %v550_v2  ;;  %v583_v37 = vpack.c.bf16 %v551_v30, %v551_v30 }
  0x6c   :  { %v584_v16 = vpack.c.bf16 %v552_v3, %v552_v3  ;;  %v585_v53 = vpack.c.bf16 %v553_v22, %v553_v22  ;;  %v663_v26 = vunpack.c.l.b16 %v570_v12  ;;  %v664_v45 = vunpack.c.l.b16 %v571_v35  ;;  %v3156_v3 = vld [vmem:[%s4698_s3 + $0x8] ss:$24 sps:$4 sm:$0xff]   ;;  %v3164_v22 = vld [vmem:[%s4698_s3 + $0x3c] ss:$24 sps:$4 sm:$0xff]   ;;  %v3162_v35 = vld [vmem:[%s4698_s3 + $0x38] ss:$24 sps:$4 sm:$0xff]  }
  0x6d   :  { %v665_v50 = vunpack.c.l.b16 %v572_v4  ;;  %v666_v5 = vunpack.c.l.b16 %v573_v60  ;;  %v667_v6 = vunpack.c.l.b16 %v574_v17  ;;  %v668_v7 = vunpack.c.l.b16 %v575_v40  ;;  %v3170_v4 = vld [vmem:[%s4698_s3 + $0x6c] ss:$24 sps:$4 sm:$0xff]   ;;  %v3168_v60 = vld [vmem:[%s4698_s3 + $0x68] ss:$24 sps:$4 sm:$0xff]   ;;  %v3176_v17 = vld [vmem:[%s4698_s3 + $0x9c] ss:$24 sps:$4 sm:$0xff]  }
  0x6e   :  { %v669_v32 = vunpack.c.l.b16 %v576_v49  ;;  %v670_v8 = vunpack.c.l.b16 %v577_v52  ;;  %v671_v33 = vrot.slane %v664_v45, 7  ;;  %v694_v36 = vunpack.c.l.b16 %v578_v15  ;;  %v3174_v40 = vld [vmem:[%s4698_s3 + $0x98] ss:$24 sps:$4 sm:$0xff]   ;;  %v3182_v49 = vld [vmem:[%s4698_s3 + $0xcc] ss:$24 sps:$4 sm:$0xff]  }
  0x6f   :  { %v673_v14 = vrot.slane %v665_v50, 6  ;;  %v675_v34 = vrot.slane %v666_v5, 5  ;;  %v677_v38 = vrot.slane %v667_v6, 4  ;;  %v679_v46 = vrot.slane %v668_v7, 3  ;;  %v3180_v52 = vld [vmem:[%s4698_s3 + $0xc8] ss:$24 sps:$4 sm:$0xff]  }
  0x70   :  { %v681_v39 = vrot.slane %v669_v32, 2  ;;  %v683_v47 = vrot.slane %v670_v8, 1  ;;  %v672_v23 = vsel %vm603_vm0, %v671_v33, %v663_v26  ;;  %v695_v48 = vunpack.c.l.b16 %v579_v61  ;;  %v3188_v15 = vld [vmem:[%s4698_s3 + $0xfc] ss:$24 sps:$4 sm:$0xff]   ;;  %v3186_v61 = vld [vmem:[%s4698_s3 + $0xf8] ss:$24 sps:$4 sm:$0xff]  }
  0x71   :  { %v696_v41 = vunpack.c.l.b16 %v580_v18  ;;  %v697_v42 = vunpack.c.l.b16 %v581_v63  ;;  %v674_v51 = vsel %vm606_vm1, %v673_v14, %v672_v23  ;;  %v698_v20 = vunpack.c.l.b16 %v582_v19  ;;  %v3194_v18 = vld [vmem:[%s4698_s3 + $0x12c] ss:$24 sps:$4 sm:$0xff]   ;;  %v3192_v63 = vld [vmem:[%s4698_s3 + $0x128] ss:$24 sps:$4 sm:$0xff]   ;;  %v3200_v19 = vld [vmem:[%s4698_s3 + $0x15c] ss:$24 sps:$4 sm:$0xff]  }
  0x72   :  { %v699_v29 = vunpack.c.l.b16 %v583_v37  ;;  %v700_v21 = vunpack.c.l.b16 %v584_v16  ;;  %v676_v62 = vsel %vm609_vm2, %v675_v34, %v674_v51  ;;  %v701_v27 = vunpack.c.l.b16 %v585_v53  ;;  %v3198_v37 = vld [vmem:[%s4698_s3 + $0x158] ss:$24 sps:$4 sm:$0xff]   ;;  %v3206_v16 = vld [vmem:[%s4698_s3 + $0x18c] ss:$24 sps:$4 sm:$0xff]   ;;  %v3204_v53 = vld [vmem:[%s4698_s3 + $0x188] ss:$24 sps:$4 sm:$0xff]  }
  0x73   :  { %v702_v0 = vrot.slane %v694_v36, 3  ;;  %v703_v28 = vrot.slane %v695_v48, 2  ;;  %v678_v13 = vsel %vm612_vm3, %v677_v38, %v676_v62  ;;  %v705_v31 = vrot.slane %v696_v41, 1  ;;  %v3212_v26 = vld [vmem:[%s4698_s3 + $0x1bc] ss:$24 sps:$4 sm:$0xff]  }
  0x74   :  { %v708_v44 = vrot.slane %v698_v20, 7  ;;  %v680_v24 = vsel %vm615_vm4, %v679_v46, %v678_v13  ;;  %v710_v55 = vrot.slane %v699_v29, 6  ;;  %v712_v9 = vrot.slane %v700_v21, 5  ;;  %v3210_v45 = vld [vmem:[%s4698_s3 + $0x1b8] ss:$24 sps:$4 sm:$0xff]  }
  0x75   :  { %v704_v54 = vsel %vm603_vm0, %v703_v28, %v702_v0  ;;  %v682_v56 = vsel %vm618_vm5, %v681_v39, %v680_v24  ;;  %v714_v10 = vrot.slane %v701_v27, 4  ;;  %v3218_v50 = vld [vmem:[%s4698_s3 + $0x1ec] ss:$24 sps:$4 sm:$0xff]   ;;  %v3216_v5 = vld [vmem:[%s4698_s3 + $0x1e8] ss:$24 sps:$4 sm:$0xff]  }
  0x76   :  { %v706_v25 = vsel %vm606_vm1, %v705_v31, %v704_v54  ;;  %v684_v57 = vsel %vm621_vm6, %v683_v47, %v682_v56  ;;  %v3224_v6 = vld [vmem:[%s4698_s3 + $0x21c] ss:$24 sps:$4 sm:$0xff]   ;;  %v3222_v7 = vld [vmem:[%s4698_s3 + $0x218] ss:$24 sps:$4 sm:$0xff]   ;;  %v3230_v32 = vld [vmem:[%s4698_s3 + $0x24c] ss:$24 sps:$4 sm:$0xff]  }
  0x77   :  { %v707_v58 = vsel %vm609_vm2, %v697_v42, %v706_v25  ;;  %v685_v59 = vpack.c.b16 %v684_v57, %v684_v57  ;;  %v3228_v8 = vld [vmem:[%s4698_s3 + $0x248] ss:$24 sps:$4 sm:$0xff]   ;;  %v3236_v33 = vld [vmem:[%s4698_s3 + $0x27c] ss:$24 sps:$4 sm:$0xff]   ;;  %v3234_v14 = vld [vmem:[%s4698_s3 + $0x278] ss:$24 sps:$4 sm:$0xff]  }
  0x78   :  { %v709_v43 = vsel %vm612_vm3, %v708_v44, %v707_v58  ;;  %v3238_v34 = vld [vmem:[%s4698_s3 + $0x2a4] ss:$24 sps:$4 sm:$0xff]   ;;  %v3240_v38 = vld [vmem:[%s4698_s3 + $0x2a8] ss:$24 sps:$4 sm:$0xff]   ;;  %v3244_v39 = vld [vmem:[%s4698_s3 + $0x2d4] ss:$24 sps:$4 sm:$0xff]  }
  0x79   :  { %v711_v11 = vsel %vm615_vm4, %v710_v55, %v709_v43  ;;  %v3242_v36 = vld [vmem:[%s4698_s3 + $0x2ac] ss:$24 sps:$4 sm:$0xff]   ;;  %v3243_v46 = vld [vmem:[%s4698_s3 + $0x2a0] ss:$24 sps:$4 sm:$0xff]   ;;  %2013 = vmatprep.subr.bf16.mxu1 %v3238_v34  ;;  %v3248_v47 = vld [vmem:[%s4698_s3 + $0x2dc] ss:$24 sps:$4 sm:$0xff]  }
  0x7a   :  { %v713_v1 = vsel %vm618_vm5, %v712_v9, %v711_v11  ;;  %2014 = vmatpush1.bf16.msra.mxu1 %v3243_v46  ;;  %v3246_v23 = vld [vmem:[%s4698_s3 + $0x2d8] ss:$24 sps:$4 sm:$0xff]   ;;  %v3252_v41 = vld [vmem:[%s4698_s3 + $0x304] ss:$24 sps:$4 sm:$0xff]   ;;  %v2815_v51 = vld [vmem:[%s4699_s2] ss:$0 sm:$0xff] }
  0x7b   :  { %v715_v2 = vsel %vm621_vm6, %v714_v10, %v713_v1  ;;  %v3249_v48 = vld [vmem:[%s4698_s3 + $0x2d0] ss:$24 sps:$4 sm:$0xff]   ;;  %2015 = vmatprep.subr.bf16.mxu1 %v3244_v39  ;;  %v3255_v42 = vld [vmem:[%s4698_s3 + $0x30c] ss:$24 sps:$4 sm:$0xff]   ;;  %v3250_v55 = vld [vmem:[%s4698_s3 + $0x300] ss:$24 sps:$4 sm:$0xff]  }
  0x7c   :  { %v716_v30 = vpack.c.b16 %v715_v2, %v715_v2  ;;  %v3253_v56 = vld [vmem:[%s4698_s3 + $0x308] ss:$24 sps:$4 sm:$0xff]   ;;  %v3258_v9 = vld [vmem:[%s4698_s3 + $0x334] ss:$24 sps:$4 sm:$0xff]   ;;  %v3259_v43 = vld [vmem:[%s4698_s3 + $0x338] ss:$24 sps:$4 sm:$0xff]  }
  0x7d   :  { %v3261_v57 = vld [vmem:[%s4698_s3 + $0x33c] ss:$24 sps:$4 sm:$0xff]   ;;  %v3256_v10 = vld [vmem:[%s4698_s3 + $0x330] ss:$24 sps:$4 sm:$0xff]   ;;  %v3262_v1 = vld [vmem:[%s4698_s3 + $0x360] ss:$24 sps:$4 sm:$0xff]  }
  0x7e   :  { %v723_v12 = vsel %vm717_vm7, %v685_v59, %v716_v30  ;;  %2016 = vmatpush1.bf16.msra.mxu1 %v3249_v48  ;;  %v3264_v11 = vld [vmem:[%s4698_s3 + $0x364] ss:$24 sps:$4 sm:$0xff]   ;;  %v3265_v2 = vld [vmem:[%s4698_s3 + $0x368] ss:$24 sps:$4 sm:$0xff]   ;;  %v3270_v30 = vld [vmem:[%s4698_s3 + $0x394] ss:$24 sps:$4 sm:$0xff]  }
  0x7f   :  { %3132 = vmatmul.mubr.msk.bf16.vlgmr.msra.gmra.mrb[0].mxu0 %vm739_vm8, %v723_v12  ;;  %2026 = vmatprep.subr.bf16.mxu1 %v3252_v41  ;;  %v3267_v59 = vld [vmem:[%s4698_s3 + $0x36c] ss:$24 sps:$4 sm:$0xff]   ;;  %v3271_v12 = vld [vmem:[%s4698_s3 + $0x398] ss:$24 sps:$4 sm:$0xff]   ;;  %v3321_v39 = vld [vmem:[%s4698_s3 + $0x51c] ss:$24 sps:$4 sm:$0xff]  }
  0x80   :  { %2068 = vmatpush1.bf16.msra.mxu0 %v3156_v3  ;;  %v3273_v3 = vld [vmem:[%s4698_s3 + $0x39c] ss:$24 sps:$4 sm:$0xff]   ;;  %v3315_v34 = vld [vmem:[%s4698_s3 + $0x4ec] ss:$24 sps:$4 sm:$0xff]  }
  0x81   :  { %2069 = vmatprep.subr.bf16.mxu0 %v3164_v22  ;;  %v3268_v22 = vld [vmem:[%s4698_s3 + $0x390] ss:$24 sps:$4 sm:$0xff]   ;;  %v3318_v46 = vld [vmem:[%s4698_s3 + $0x514] ss:$24 sps:$4 sm:$0xff]   ;;  %v3324_v48 = vld [vmem:[%s4698_s3 + $0x544] ss:$24 sps:$4 sm:$0xff]  }
  0x82   :  { %v3327_v41 = vld [vmem:[%s4698_s3 + $0x54c] ss:$24 sps:$4 sm:$0xff]  }
  0x84   :  { %2070 = vmatpush1.bf16.msra.mxu0 %v3162_v35  ;;  %v3276_v35 = vld [vmem:[%s4698_s3 + $0x3c4] ss:$24 sps:$4 sm:$0xff]  }
  0x85   :  { %2071 = vmatprep.subr.bf16.mxu0 %v3170_v4  ;;  %v3279_v4 = vld [vmem:[%s4698_s3 + $0x3cc] ss:$24 sps:$4 sm:$0xff]  }
  0x88   :  { %2072 = vmatpush1.bf16.msra.mxu0 %v3168_v60  ;;  %v3274_v60 = vld [vmem:[%s4698_s3 + $0x3c0] ss:$24 sps:$4 sm:$0xff]  }
  0x89   :  { %2073 = vmatprep.subr.bf16.mxu0 %v3176_v17  ;;  %v3277_v17 = vld [vmem:[%s4698_s3 + $0x3c8] ss:$24 sps:$4 sm:$0xff]  }
  0x8c   :  { %2074 = vmatpush1.bf16.msra.mxu0 %v3174_v40  ;;  %v3282_v40 = vld [vmem:[%s4698_s3 + $0x3f4] ss:$24 sps:$4 sm:$0xff]  }
  0x8d   :  { %2075 = vmatprep.subr.bf16.mxu0 %v3182_v49  ;;  %v3285_v49 = vld [vmem:[%s4698_s3 + $0x3fc] ss:$24 sps:$4 sm:$0xff]  }
  0x90   :  { %2076 = vmatpush1.bf16.msra.mxu0 %v3180_v52  ;;  %v3280_v52 = vld [vmem:[%s4698_s3 + $0x3f0] ss:$24 sps:$4 sm:$0xff]  }
  0x91   :  { %2077 = vmatprep.subr.bf16.mxu0 %v3188_v15  ;;  %v3283_v15 = vld [vmem:[%s4698_s3 + $0x3f8] ss:$24 sps:$4 sm:$0xff]  }
  0x94   :  { %2078 = vmatpush1.bf16.msra.mxu0 %v3186_v61  ;;  %v3288_v61 = vld [vmem:[%s4698_s3 + $0x424] ss:$24 sps:$4 sm:$0xff]  }
  0x95   :  { %2079 = vmatprep.subr.bf16.mxu0 %v3194_v18  ;;  %v3291_v18 = vld [vmem:[%s4698_s3 + $0x42c] ss:$24 sps:$4 sm:$0xff]  }
  0x98   :  { %2080 = vmatpush1.bf16.msra.mxu0 %v3192_v63  ;;  %v3286_v63 = vld [vmem:[%s4698_s3 + $0x420] ss:$24 sps:$4 sm:$0xff]  }
  0x99   :  { %2081 = vmatprep.subr.bf16.mxu0 %v3200_v19  ;;  %v3289_v19 = vld [vmem:[%s4698_s3 + $0x428] ss:$24 sps:$4 sm:$0xff]  }
  0x9c   :  { %2082 = vmatpush1.bf16.msra.mxu0 %v3198_v37  ;;  %v3294_v37 = vld [vmem:[%s4698_s3 + $0x454] ss:$24 sps:$4 sm:$0xff]  }
  0x9d   :  { %2083 = vmatprep.subr.bf16.mxu0 %v3206_v16  ;;  %v3297_v16 = vld [vmem:[%s4698_s3 + $0x45c] ss:$24 sps:$4 sm:$0xff]  }
  0xa0   :  { %2084 = vmatpush1.bf16.msra.mxu0 %v3204_v53  ;;  %v3292_v53 = vld [vmem:[%s4698_s3 + $0x450] ss:$24 sps:$4 sm:$0xff]  }
  0xa1   :  { %2085 = vmatprep.subr.bf16.mxu0 %v3212_v26  ;;  %v3295_v26 = vld [vmem:[%s4698_s3 + $0x458] ss:$24 sps:$4 sm:$0xff]  }
  0xa4   :  { %2086 = vmatpush1.bf16.msra.mxu0 %v3210_v45  ;;  %v3300_v45 = vld [vmem:[%s4698_s3 + $0x484] ss:$24 sps:$4 sm:$0xff]  }
  0xa5   :  { %2087 = vmatprep.subr.bf16.mxu0 %v3218_v50  ;;  %v3303_v50 = vld [vmem:[%s4698_s3 + $0x48c] ss:$24 sps:$4 sm:$0xff]  }
  0xa8   :  { %2088 = vmatpush1.bf16.msra.mxu0 %v3216_v5  ;;  %v3298_v5 = vld [vmem:[%s4698_s3 + $0x480] ss:$24 sps:$4 sm:$0xff]  }
  0xa9   :  { %2089 = vmatprep.subr.bf16.mxu0 %v3224_v6  ;;  %v3301_v6 = vld [vmem:[%s4698_s3 + $0x488] ss:$24 sps:$4 sm:$0xff]  }
  0xac   :  { %2090 = vmatpush1.bf16.msra.mxu0 %v3222_v7  ;;  %v3306_v7 = vld [vmem:[%s4698_s3 + $0x4b4] ss:$24 sps:$4 sm:$0xff]  }
  0xad   :  { %2091 = vmatprep.subr.bf16.mxu0 %v3230_v32  ;;  %v3309_v32 = vld [vmem:[%s4698_s3 + $0x4bc] ss:$24 sps:$4 sm:$0xff]  }
  0xb0   :  { %2092 = vmatpush1.bf16.msra.mxu0 %v3228_v8  ;;  %v3304_v8 = vld [vmem:[%s4698_s3 + $0x4b0] ss:$24 sps:$4 sm:$0xff]  }
  0xb1   :  { %2093 = vmatprep.subr.bf16.mxu0 %v3236_v33  ;;  %v3307_v33 = vld [vmem:[%s4698_s3 + $0x4b8] ss:$24 sps:$4 sm:$0xff]  }
  0xb4   :  { %2094 = vmatpush1.bf16.msra.mxu0 %v3234_v14  ;;  %v3312_v14 = vld [vmem:[%s4698_s3 + $0x4e4] ss:$24 sps:$4 sm:$0xff]  }
  0xb5   :  { %2095 = vmatprep.subr.bf16.mxu0 %v3242_v36  ;;  %v3310_v36 = vld [vmem:[%s4698_s3 + $0x4e0] ss:$24 sps:$4 sm:$0xff]  }
  0xb8   :  { %2096 = vmatpush1.bf16.msra.mxu0 %v3240_v38  ;;  %v3313_v38 = vld [vmem:[%s4698_s3 + $0x4e8] ss:$24 sps:$4 sm:$0xff]  }
  0xb9   :  { %2097 = vmatprep.subr.bf16.mxu0 %v3248_v47  ;;  %v3316_v47 = vld [vmem:[%s4698_s3 + $0x510] ss:$24 sps:$4 sm:$0xff]  }
  0xbc   :  { %2098 = vmatpush1.bf16.msra.mxu0 %v3246_v23  ;;  %v3319_v23 = vld [vmem:[%s4698_s3 + $0x518] ss:$24 sps:$4 sm:$0xff]  }
  0xbd   :  { %2108 = vmatprep.subr.bf16.mxu0 %v3255_v42  ;;  %v3322_v42 = vld [vmem:[%s4698_s3 + $0x540] ss:$24 sps:$4 sm:$0xff]  }
 0x152   :  { %v3133_v20 = vpop.f32.mrb[0].mxu0 }
 0x153   :  { %v4126_v29 = vadd.f32 %v3133_v20, %v2815_v51  ;;  %v778_v21 = vpop.f32.mrb[1].mxu0  ;;  %v3330_v20 = vld [vmem:[%s4698_s3 + $0x574] ss:$24 sps:$4 sm:$0xff]  }
 0x154   :  { %v779_v62 = vadd.f32 %v2815_v51, %v778_v21  ;;  %v3134_v27 = vpop.f32.mrb[2].mxu0  ;;  %v3333_v21 = vld [vmem:[%s4698_s3 + $0x57c] ss:$24 sps:$4 sm:$0xff]  }
 0x155   :  { %v790_v0 = vadd.f32 %v3134_v27, %v2815_v51  ;;  %v781_v28 = vpop.f32.mrb[3].mxu0  ;;  %v3331_v27 = vld [vmem:[%s4698_s3 + $0x578] ss:$24 sps:$4 sm:$0xff]  }
 0x156   :  { %v782_v13 = vadd.f32 %v2815_v51, %v781_v28  ;;  %v793_v31 = vmax.f32 %v779_v62, 0.0  ;;  %v3325_v51 = vld [vmem:[%s4698_s3 + $0x548] ss:$24 sps:$4 sm:$0xff]   ;;  %v3339_v28 = vld [vmem:[%s4698_s3 + $0x5ac] ss:$24 sps:$4 sm:$0xff]  }
 0x157   :  { %v796_v24 = vmax.f32 %v790_v0, 0.0  ;;  %v3328_v62 = vld [vmem:[%s4698_s3 + $0x570] ss:$24 sps:$4 sm:$0xff]   ;;  %v3336_v0 = vld [vmem:[%s4698_s3 + $0x5a4] ss:$24 sps:$4 sm:$0xff]  }
 0x158   :  { %v794_v44 = vmax.f32 %v782_v13, 0.0  ;;  %v4136_v25 = vpack.c.bf16 %v793_v31, %v793_v31  ;;  %v3334_v13 = vld [vmem:[%s4698_s3 + $0x5a0] ss:$24 sps:$4 sm:$0xff]  }
 0x159   :  { %v4146_v58 = vpack.c.bf16 %v796_v24, %v796_v24  ;;  %v3337_v31 = vld [vmem:[%s4698_s3 + $0x5a8] ss:$24 sps:$4 sm:$0xff]   ;;  %v3345_v24 = vld [vmem:[%s4698_s3 + $0x5dc] ss:$24 sps:$4 sm:$0xff]  }
 0x15a   :  { %v4128_v54 = vpack.c.bf16 %v794_v44, %v794_v44  ;;  %v3342_v44 = vld [vmem:[%s4698_s3 + $0x5d4] ss:$24 sps:$4 sm:$0xff]  }
 0x15c   :  { %2017 = vmatprep.mubr.bf16.mxu1 %v4128_v54  ;;  %2099 = vmatprep.mubr.bf16.mxu0 %v4128_v54 }
 0x15d   :  { %2018 = vmatmul.mubr.bf16.vlgmr.msra.gmra.mrb[0].mxu1 %v4136_v25  ;;  %2100 = vmatmul.mubr.bf16.vlgmr.msra.gmra.mrb[4].mxu0 %v4136_v25 }
 0x15e   :  { %2027 = vmatpush1.bf16.msra.mxu1 %v3250_v55  ;;  %2109 = vmatpush1.bf16.msra.mxu0 %v3253_v56  ;;  %v3340_v55 = vld [vmem:[%s4698_s3 + $0x5d0] ss:$24 sps:$4 sm:$0xff]  }
 0x15f   :  { %2058 = vmatprep.mubr.bf16.mxu1 %v4146_v58  ;;  %2140 = vmatprep.mubr.bf16.mxu0 %v4146_v58  ;;  %v3343_v56 = vld [vmem:[%s4698_s3 + $0x5d8] ss:$24 sps:$4 sm:$0xff]  }
 0x160   :  { %2028 = vmatprep.subr.bf16.mxu1 %v3258_v9  ;;  %2110 = vmatprep.subr.bf16.mxu0 %v3261_v57  ;;  %v795_v9 = vmax.f32 %v4126_v29, 0.0  ;;  %v3348_v57 = vld [vmem:[%s4698_s3 + $0x14] ss:$24 sps:$4 sm:$0xff]   ;;  %v3349_v29 = vld [vmem:[%s4698_s3 + $0x40] ss:$24 sps:$4 sm:$0xff]  }
 0x162   :  { %2029 = vmatpush1.bf16.msra.mxu1 %v3256_v10  ;;  %2111 = vmatpush1.bf16.msra.mxu0 %v3259_v43  ;;  %v3346_v10 = vld [vmem:[%s4698_s3 + $0x10] ss:$24 sps:$4 sm:$0xff]   ;;  %v4333_v43 = vpack.c.bf16 %v795_v9, %v795_v9  ;;  %v3457_v9 = vld [vmem:[%s4700_s5 + $0x38] sm:$0xff]  }
 0x163   :  { %2030 = vmatprep.subr.bf16.mxu1 %v3264_v11  ;;  %2112 = vmatprep.subr.bf16.mxu0 %v3267_v59  ;;  %v3351_v11 = vld [vmem:[%s4698_s3 + $0x44] ss:$24 sps:$4 sm:$0xff]   ;;  %v3354_v59 = vld [vmem:[%s4698_s3 + $0x74] ss:$24 sps:$4 sm:$0xff]  }
 0x166   :  { %2031 = vmatpush1.bf16.msra.mxu1 %v3262_v1  ;;  %2113 = vmatpush1.bf16.msra.mxu0 %v3265_v2  ;;  %v3442_v1 = vld [vmem:[%s4700_s5 + $0x40] sm:$0xff]  }
 0x167   :  { %2032 = vmatprep.subr.bf16.mxu1 %v3270_v30  ;;  %2114 = vmatprep.subr.bf16.mxu0 %v3273_v3  ;;  %v3443_v2 = vld [vmem:[%s4700_s5] sm:$0xff]   ;;  %v3352_v30 = vld [vmem:[%s4698_s3 + $0x70] ss:$24 sps:$4 sm:$0xff]  }
 0x168   :  { %v3444_v3 = vld [vmem:[%s4700_s5 + $0x48] sm:$0xff]  }
 0x16a   :  { %2033 = vmatpush1.bf16.msra.mxu1 %v3268_v22  ;;  %2115 = vmatpush1.bf16.msra.mxu0 %v3271_v12  ;;  %v3446_v22 = vld [vmem:[%s4700_s5 + $0x50] sm:$0xff]   ;;  %v3357_v12 = vld [vmem:[%s4698_s3 + $0xa4] ss:$24 sps:$4 sm:$0xff]  }
 0x16b   :  { %2034 = vmatprep.subr.bf16.mxu1 %v3276_v35  ;;  %2116 = vmatprep.subr.bf16.mxu0 %v3279_v4  ;;  %v3355_v35 = vld [vmem:[%s4698_s3 + $0xa0] ss:$24 sps:$4 sm:$0xff]   ;;  %v3447_v4 = vld [vmem:[%s4700_s5 + $0x10] sm:$0xff]  }
 0x16e   :  { %2035 = vmatpush1.bf16.msra.mxu1 %v3274_v60  ;;  %2117 = vmatpush1.bf16.msra.mxu0 %v3277_v17  ;;  %v3448_v60 = vld [vmem:[%s4700_s5 + $0x58] sm:$0xff]   ;;  %v3360_v17 = vld [vmem:[%s4698_s3 + $0xd4] ss:$24 sps:$4 sm:$0xff]  }
 0x16f   :  { %2036 = vmatprep.subr.bf16.mxu1 %v3282_v40  ;;  %2118 = vmatprep.subr.bf16.mxu0 %v3285_v49  ;;  %v3358_v40 = vld [vmem:[%s4698_s3 + $0xd0] ss:$24 sps:$4 sm:$0xff]   ;;  %v3363_v49 = vld [vmem:[%s4698_s3 + $0x104] ss:$24 sps:$4 sm:$0xff]  }
 0x172   :  { %2037 = vmatpush1.bf16.msra.mxu1 %v3280_v52  ;;  %2119 = vmatpush1.bf16.msra.mxu0 %v3283_v15  ;;  %v3449_v52 = vld [vmem:[%s4700_s5 + $0x18] sm:$0xff]   ;;  %v3450_v15 = vld [vmem:[%s4700_s5 + $0x60] sm:$0xff]  }
 0x173   :  { %2038 = vmatprep.subr.bf16.mxu1 %v3288_v61  ;;  %2120 = vmatprep.subr.bf16.mxu0 %v3291_v18  ;;  %v3451_v61 = vld [vmem:[%s4700_s5 + $0x20] sm:$0xff]  }
 0x174   :  { %v3361_v18 = vld [vmem:[%s4698_s3 + $0x100] ss:$24 sps:$4 sm:$0xff]  }
 0x176   :  { %2039 = vmatpush1.bf16.msra.mxu1 %v3286_v63  ;;  %2121 = vmatpush1.bf16.msra.mxu0 %v3289_v19  ;;  %v3452_v63 = vld [vmem:[%s4700_s5 + $0x68] sm:$0xff]  }
 0x177   :  { %2040 = vmatprep.subr.bf16.mxu1 %v3294_v37  ;;  %2122 = vmatprep.subr.bf16.mxu0 %v3297_v16  ;;  %v3366_v19 = vld [vmem:[%s4698_s3 + $0x134] ss:$24 sps:$4 sm:$0xff]   ;;  %v3364_v16 = vld [vmem:[%s4698_s3 + $0x130] ss:$24 sps:$4 sm:$0xff]  }
 0x178   :  { %v3453_v37 = vld [vmem:[%s4700_s5 + $0x28] sm:$0xff]  }
 0x17a   :  { %2041 = vmatpush1.bf16.msra.mxu1 %v3292_v53  ;;  %2123 = vmatpush1.bf16.msra.mxu0 %v3295_v26  ;;  %v3369_v53 = vld [vmem:[%s4698_s3 + $0x164] ss:$24 sps:$4 sm:$0xff]   ;;  %v3367_v26 = vld [vmem:[%s4698_s3 + $0x160] ss:$24 sps:$4 sm:$0xff]  }
 0x17b   :  { %2042 = vmatprep.subr.bf16.mxu1 %v3300_v45  ;;  %2124 = vmatprep.subr.bf16.mxu0 %v3303_v50  ;;  %v3372_v45 = vld [vmem:[%s4698_s3 + $0x194] ss:$24 sps:$4 sm:$0xff]   ;;  %v3370_v50 = vld [vmem:[%s4698_s3 + $0x190] ss:$24 sps:$4 sm:$0xff]  }
 0x17e   :  { %2043 = vmatpush1.bf16.msra.mxu1 %v3298_v5  ;;  %2125 = vmatpush1.bf16.msra.mxu0 %v3301_v6  ;;  %v3375_v5 = vld [vmem:[%s4698_s3 + $0x1c4] ss:$24 sps:$4 sm:$0xff]   ;;  %v3373_v6 = vld [vmem:[%s4698_s3 + $0x1c0] ss:$24 sps:$4 sm:$0xff]  }
 0x17f   :  { %2044 = vmatprep.subr.bf16.mxu1 %v3306_v7  ;;  %2126 = vmatprep.subr.bf16.mxu0 %v3309_v32  ;;  %v3378_v7 = vld [vmem:[%s4698_s3 + $0x1f4] ss:$24 sps:$4 sm:$0xff]   ;;  %v3376_v32 = vld [vmem:[%s4698_s3 + $0x1f0] ss:$24 sps:$4 sm:$0xff]  }
 0x182   :  { %2045 = vmatpush1.bf16.msra.mxu1 %v3304_v8  ;;  %2127 = vmatpush1.bf16.msra.mxu0 %v3307_v33  ;;  %v3381_v8 = vld [vmem:[%s4698_s3 + $0x224] ss:$24 sps:$4 sm:$0xff]   ;;  %v3379_v33 = vld [vmem:[%s4698_s3 + $0x220] ss:$24 sps:$4 sm:$0xff]  }
 0x183   :  { %2046 = vmatprep.subr.bf16.mxu1 %v3312_v14  ;;  %2128 = vmatprep.subr.bf16.mxu0 %v3315_v34  ;;  %v3384_v14 = vld [vmem:[%s4698_s3 + $0x254] ss:$24 sps:$4 sm:$0xff]   ;;  %v3382_v34 = vld [vmem:[%s4698_s3 + $0x250] ss:$24 sps:$4 sm:$0xff]  }
 0x186   :  { %2047 = vmatpush1.bf16.msra.mxu1 %v3310_v36  ;;  %2129 = vmatpush1.bf16.msra.mxu0 %v3313_v38  ;;  %v3387_v36 = vld [vmem:[%s4698_s3 + $0x284] ss:$24 sps:$4 sm:$0xff]   ;;  %v3385_v38 = vld [vmem:[%s4698_s3 + $0x280] ss:$24 sps:$4 sm:$0xff]  }
 0x187   :  { %2048 = vmatprep.subr.bf16.mxu1 %v3318_v46  ;;  %2130 = vmatprep.subr.bf16.mxu0 %v3321_v39  ;;  %v3390_v46 = vld [vmem:[%s4698_s3 + $0x2b4] ss:$24 sps:$4 sm:$0xff]   ;;  %v3388_v39 = vld [vmem:[%s4698_s3 + $0x2b0] ss:$24 sps:$4 sm:$0xff]  }
 0x18a   :  { %2049 = vmatpush1.bf16.msra.mxu1 %v3316_v47  ;;  %2131 = vmatpush1.bf16.msra.mxu0 %v3319_v23  ;;  %v3393_v47 = vld [vmem:[%s4698_s3 + $0x2e4] ss:$24 sps:$4 sm:$0xff]   ;;  %v3391_v23 = vld [vmem:[%s4698_s3 + $0x2e0] ss:$24 sps:$4 sm:$0xff]  }
 0x18b   :  { %2050 = vmatprep.subr.bf16.mxu1 %v3324_v48  ;;  %2132 = vmatprep.subr.bf16.mxu0 %v3327_v41  ;;  %v3396_v48 = vld [vmem:[%s4698_s3 + $0x314] ss:$24 sps:$4 sm:$0xff]   ;;  %v3394_v41 = vld [vmem:[%s4698_s3 + $0x310] ss:$24 sps:$4 sm:$0xff]  }
 0x18e   :  { %2051 = vmatpush1.bf16.msra.mxu1 %v3322_v42  ;;  %2133 = vmatpush1.bf16.msra.mxu0 %v3325_v51  ;;  %v3399_v42 = vld [vmem:[%s4698_s3 + $0x344] ss:$24 sps:$4 sm:$0xff]   ;;  %v3397_v51 = vld [vmem:[%s4698_s3 + $0x340] ss:$24 sps:$4 sm:$0xff]  }
 0x18f   :  { %2052 = vmatprep.subr.bf16.mxu1 %v3330_v20  ;;  %2134 = vmatprep.subr.bf16.mxu0 %v3333_v21  ;;  %v3402_v20 = vld [vmem:[%s4698_s3 + $0x374] ss:$24 sps:$4 sm:$0xff]   ;;  %v3400_v21 = vld [vmem:[%s4698_s3 + $0x370] ss:$24 sps:$4 sm:$0xff]  }
 0x192   :  { %2053 = vmatpush1.bf16.msra.mxu1 %v3328_v62  ;;  %2135 = vmatpush1.bf16.msra.mxu0 %v3331_v27  ;;  %v3408_v62 = vld [vmem:[%s4698_s3 + $0x3d4] ss:$24 sps:$4 sm:$0xff]   ;;  %v3406_v27 = vld [vmem:[%s4698_s3 + $0x3d0] ss:$24 sps:$4 sm:$0xff]  }
 0x193   :  { %2054 = vmatprep.subr.bf16.mxu1 %v3336_v0  ;;  %2136 = vmatprep.subr.bf16.mxu0 %v3339_v28  ;;  %v3411_v0 = vld [vmem:[%s4698_s3 + $0x404] ss:$24 sps:$4 sm:$0xff]   ;;  %v3409_v28 = vld [vmem:[%s4698_s3 + $0x400] ss:$24 sps:$4 sm:$0xff]  }
 0x196   :  { %2055 = vmatpush1.bf16.msra.mxu1 %v3334_v13  ;;  %2137 = vmatpush1.bf16.msra.mxu0 %v3337_v31  ;;  %v3454_v13 = vld [vmem:[%s4700_s5 + $0x70] sm:$0xff]  }
 0x197   :  { %2056 = vmatprep.subr.bf16.mxu1 %v3342_v44  ;;  %2138 = vmatprep.subr.bf16.mxu0 %v3345_v24  ;;  %v3414_v31 = vld [vmem:[%s4698_s3 + $0x434] ss:$24 sps:$4 sm:$0xff]   ;;  %v3412_v24 = vld [vmem:[%s4698_s3 + $0x430] ss:$24 sps:$4 sm:$0xff]  }
 0x198   :  { %v3455_v44 = vld [vmem:[%s4700_s5 + $0x30] sm:$0xff]  }
 0x19a   :  { %2057 = vmatpush1.bf16.msra.mxu1 %v3340_v55  ;;  %2139 = vmatpush1.bf16.msra.mxu0 %v3343_v56  ;;  %v3456_v55 = vld [vmem:[%s4700_s5 + $0x78] sm:$0xff]  }
 0x19b   :  { %2149 = vmatprep.subr.bf16.mxu1 %v3348_v57  ;;  %3063 = vmatprep.subr.bf16.mxu0 %v3442_v1  ;;  %v3417_v56 = vld [vmem:[%s4698_s3 + $0x464] ss:$24 sps:$4 sm:$0xff]   ;;  %v3415_v57 = vld [vmem:[%s4698_s3 + $0x460] ss:$24 sps:$4 sm:$0xff]  }
 0x19c   :  { %v3421_v1 = vld [vmem:[%s4698_s3 + $0x4c0] ss:$24 sps:$4 sm:$0xff]  }
 0x19d   :  { %2059 = vmatmul.mubr.bf16.vlgmr.msra.gmra.mrb[0].mxu1 %v4333_v43  ;;  %2141 = vmatmul.mubr.bf16.vlgmr.msra.gmra.mrb[4].mxu0 %v4333_v43 }
 0x19e   :  { %2150 = vmatpush1.bf16.msra.mxu1 %v3346_v10  ;;  %2181 = vmatprep.mubr.bf16.mxu1 %v4128_v54  ;;  %v3445_v54 = vld [vmem:[%s4700_s5 + $0x8] sm:$0xff]   ;;  %v3458_v10 = vld [vmem:[%s4700_s5 + $0xc0] sm:$0xff]  }
 0x19f   :  { %2151 = vmatprep.subr.bf16.mxu1 %v3351_v11  ;;  %3064 = vmatpush3.bf16.msra.mxu0 %v3443_v2  ;;  %v3420_v11 = vld [vmem:[%s4698_s3 + $0x494] ss:$24 sps:$4 sm:$0xff]  }
 0x1a0   :  { %3065 = vmatprep.subr.bf16.mxu0 %v3444_v3  ;;  %v3426_v2 = vld [vmem:[%s4698_s3 + $0x4f4] ss:$24 sps:$4 sm:$0xff]   ;;  %v3429_v3 = vld [vmem:[%s4698_s3 + $0x524] ss:$24 sps:$4 sm:$0xff]  }
 0x1a2   :  { %2152 = vmatpush1.bf16.msra.mxu1 %v3349_v29  ;;  %v3418_v29 = vld [vmem:[%s4698_s3 + $0x490] ss:$24 sps:$4 sm:$0xff]  }
 0x1a3   :  { %2153 = vmatprep.subr.bf16.mxu1 %v3354_v59  ;;  %3066 = vmatpush3.bf16.msra.mxu0 %v3445_v54  ;;  %v3423_v59 = vld [vmem:[%s4698_s3 + $0x4c4] ss:$24 sps:$4 sm:$0xff]   ;;  %v3427_v54 = vld [vmem:[%s4698_s3 + $0x520] ss:$24 sps:$4 sm:$0xff]  }
 0x1a4   :  { %3067 = vmatprep.subr.bf16.mxu0 %v3446_v22  ;;  %v3432_v22 = vld [vmem:[%s4698_s3 + $0x554] ss:$24 sps:$4 sm:$0xff]  }
 0x1a6   :  { %2154 = vmatpush1.bf16.msra.mxu1 %v3352_v30  ;;  %v3424_v30 = vld [vmem:[%s4698_s3 + $0x4f0] ss:$24 sps:$4 sm:$0xff]  }
 0x1a7   :  { %2155 = vmatprep.subr.bf16.mxu1 %v3357_v12  ;;  %3068 = vmatpush3.bf16.msra.mxu0 %v3447_v4  ;;  %v3430_v12 = vld [vmem:[%s4698_s3 + $0x550] ss:$24 sps:$4 sm:$0xff]   ;;  %v3433_v4 = vld [vmem:[%s4698_s3 + $0x580] ss:$24 sps:$4 sm:$0xff]  }
 0x1a8   :  { %3069 = vmatprep.subr.bf16.mxu0 %v3448_v60  ;;  %v3438_v60 = vld [vmem:[%s4698_s3 + $0x5b4] ss:$24 sps:$4 sm:$0xff]  }
 0x1aa   :  { %2156 = vmatpush1.bf16.msra.mxu1 %v3355_v35  ;;  %v3435_v35 = vld [vmem:[%s4698_s3 + $0x584] ss:$24 sps:$4 sm:$0xff]  }
 0x1ab   :  { %2157 = vmatprep.subr.bf16.mxu1 %v3360_v17  ;;  %3070 = vmatpush3.bf16.msra.mxu0 %v3449_v52  ;;  %v3436_v17 = vld [vmem:[%s4698_s3 + $0x5b0] ss:$24 sps:$4 sm:$0xff]   ;;  %v995_v52 = vlaneseq }
 0x1ac   :  { %3071 = vmatprep.subr.bf16.mxu0 %v3450_v15 }
 0x1ad   :  { %v4578_v15 = vshrl.u32 %v995_v52, 7 }
 0x1ae   :  { %2158 = vmatpush1.bf16.msra.mxu1 %v3358_v40  ;;  %v3441_v40 = vld [vmem:[%s4698_s3 + $0x5e4] ss:$24 sps:$4 sm:$0xff]  }
 0x1af   :  { %2159 = vmatprep.subr.bf16.mxu1 %v3363_v49  ;;  %3072 = vmatpush3.bf16.msra.mxu0 %v3451_v61  ;;  %v3439_v49 = vld [vmem:[%s4698_s3 + $0x5e0] ss:$24 sps:$4 sm:$0xff]   ;;  %v997_v61 = vsub.s32 0, %v4578_v15 }
 0x1b0   :  { %3073 = vmatprep.subr.bf16.mxu0 %v3452_v63  ;;  %v1001_v63 = vsub.s32 1, %v4578_v15 }
 0x1b2   :  { %2160 = vmatpush1.bf16.msra.mxu1 %v3361_v18  ;;  %v4584_v18 = vld [vmem:[%s4701_s4] sm:$0x3f] }
 0x1b3   :  { %2161 = vmatprep.subr.bf16.mxu1 %v3366_v19  ;;  %3074 = vmatpush3.bf16.msra.mxu0 %v3453_v37  ;;  %v1009_v19 = vsub.s32 3, %v4578_v15  ;;  %v998_v37 = vrot.slane %v4584_v18, %v997_v61 }
 0x1b4   :  { %3075 = vmatprep.subr.bf16.mxu0 %v3454_v13  ;;  %v3470_v13 = vld [vmem:[%s4700_s5 + $0xf0] sm:$0xff]  }
 0x1b6   :  { %2162 = vmatpush1.bf16.msra.mxu1 %v3364_v16  ;;  %v1002_v16 = vrot.slane %v4584_v18, %v1001_v63 }
 0x1b7   :  { %2163 = vmatprep.subr.bf16.mxu1 %v3369_v53  ;;  %3076 = vmatpush3.bf16.msra.mxu0 %v3455_v44 }
 0x1b8   :  { %3077 = vmatprep.subr.bf16.mxu0 %v3456_v55  ;;  %v3473_v55 = vld [vmem:[%s4700_s5 + $0xb8] sm:$0xff]  }
 0x1ba   :  { %2164 = vmatpush1.bf16.msra.mxu1 %v3367_v26 }
 0x1bb   :  { %2165 = vmatprep.subr.bf16.mxu1 %v3372_v45  ;;  %3078 = vmatpush3.bf16.msra.mxu0 %v3457_v9  ;;  %v3474_v9 = vld [vmem:[%s4700_s5 + $0x140] sm:$0xff]  }
 0x1bc   :  { %3085 = vmatprep.subr.bf16.mxu0 %v3458_v10 }
 0x1be   :  { %2166 = vmatpush1.bf16.msra.mxu1 %v3370_v50 }
 0x1bf   :  { %2167 = vmatprep.subr.bf16.mxu1 %v3375_v5 }
 0x1c2   :  { %2168 = vmatpush1.bf16.msra.mxu1 %v3373_v6 }
 0x1c3   :  { %2169 = vmatprep.subr.bf16.mxu1 %v3378_v7 }
 0x1c6   :  { %2170 = vmatpush1.bf16.msra.mxu1 %v3376_v32 }
 0x1c7   :  { %2171 = vmatprep.subr.bf16.mxu1 %v3381_v8 }
 0x1ca   :  { %2172 = vmatpush1.bf16.msra.mxu1 %v3379_v33 }
 0x1cb   :  { %2173 = vmatprep.subr.bf16.mxu1 %v3384_v14 }
 0x1ce   :  { %2174 = vmatpush1.bf16.msra.mxu1 %v3382_v34 }
 0x1cf   :  { %2175 = vmatprep.subr.bf16.mxu1 %v3387_v36 }
 0x1d2   :  { %2176 = vmatpush1.bf16.msra.mxu1 %v3385_v38 }
 0x1d3   :  { %2177 = vmatprep.subr.bf16.mxu1 %v3390_v46 }
 0x1d6   :  { %2178 = vmatpush1.bf16.msra.mxu1 %v3388_v39  ;;  %v3459_v39 = vld [vmem:[%s4700_s5 + $0x80] sm:$0xff]  }
 0x1d7   :  { %2179 = vmatprep.subr.bf16.mxu1 %v3393_v47 }
 0x1da   :  { %2180 = vmatpush1.bf16.msra.mxu1 %v3391_v23  ;;  %v3460_v23 = vld [vmem:[%s4700_s5 + $0xc8] sm:$0xff]  }
 0x1db   :  { %2190 = vmatprep.subr.bf16.mxu1 %v3396_v48 }
 0x1dd   :  { %2182 = vmatmul.mubr.bf16.vlgmr.msra.gmra.mrb[4].mxu1 %v4136_v25  ;;  %v3405_v25 = vld [vmem:[%s4698_s3 + $0x3a4] ss:$24 sps:$4 sm:$0xff]  }
 0x1de   :  { %2191 = vmatpush1.bf16.msra.mxu1 %v3394_v41  ;;  %2222 = vmatprep.mubr.bf16.mxu1 %v4146_v58  ;;  %v3403_v58 = vld [vmem:[%s4698_s3 + $0x3a0] ss:$24 sps:$4 sm:$0xff]   ;;  %v3461_v41 = vld [vmem:[%s4700_s5 + $0x88] sm:$0xff]  }
 0x1df   :  { %2192 = vmatprep.subr.bf16.mxu1 %v3399_v42  ;;  %v3462_v42 = vld [vmem:[%s4700_s5 + $0xd0] sm:$0xff]  }
 0x1e2   :  { %2193 = vmatpush1.bf16.msra.mxu1 %v3397_v51  ;;  %v3463_v51 = vld [vmem:[%s4700_s5 + $0x90] sm:$0xff]  }
 0x1e3   :  { %2194 = vmatprep.subr.bf16.mxu1 %v3402_v20  ;;  %v3464_v20 = vld [vmem:[%s4700_s5 + $0xd8] sm:$0xff]  }
 0x1e6   :  { %2195 = vmatpush1.bf16.msra.mxu1 %v3400_v21  ;;  %v3465_v21 = vld [vmem:[%s4700_s5 + $0x98] sm:$0xff]  }
 0x1e7   :  { %2196 = vmatprep.subr.bf16.mxu1 %v3405_v25  ;;  %v3466_v25 = vld [vmem:[%s4700_s5 + $0xe0] sm:$0xff]  }
 0x1ea   :  { %2197 = vmatpush1.bf16.msra.mxu1 %v3403_v58  ;;  %v3467_v58 = vld [vmem:[%s4700_s5 + $0xa0] sm:$0xff]  }
 0x1eb   :  { %2198 = vmatprep.subr.bf16.mxu1 %v3408_v62  ;;  %v1005_v62 = vsub.s32 2, %v4578_v15 }
 0x1ee   :  { %2199 = vmatpush1.bf16.msra.mxu1 %v3406_v27  ;;  %v3468_v27 = vld [vmem:[%s4700_s5 + $0xe8] sm:$0xff]  }
 0x1ef   :  { %2200 = vmatprep.subr.bf16.mxu1 %v3411_v0  ;;  %v3469_v0 = vld [vmem:[%s4700_s5 + $0xa8] sm:$0xff]  }
 0x1f2   :  { %2201 = vmatpush1.bf16.msra.mxu1 %v3409_v28  ;;  %v1006_v28 = vrot.slane %v4584_v18, %v1005_v62 }
 0x1f3   :  { %2202 = vmatprep.subr.bf16.mxu1 %v3414_v31  ;;  %v3471_v31 = vld [vmem:[%s4700_s5 + $0xb0] sm:$0xff]  }
 0x1f6   :  { %2203 = vmatpush1.bf16.msra.mxu1 %v3412_v24  ;;  %v3472_v24 = vld [vmem:[%s4700_s5 + $0xf8] sm:$0xff]  }
 0x1f7   :  { %2204 = vmatprep.subr.bf16.mxu1 %v3417_v56 }
 0x1fa   :  { %2205 = vmatpush1.bf16.msra.mxu1 %v3415_v57  ;;  %v3475_v57 = vld [vmem:[%s4700_s5 + $0x100] sm:$0xff]  }
 0x1fb   :  { %2206 = vmatprep.subr.bf16.mxu1 %v3420_v11  ;;  %v3476_v11 = vld [vmem:[%s4700_s5 + $0x148] sm:$0xff]  }
 0x1fe   :  { %2207 = vmatpush1.bf16.msra.mxu1 %v3418_v29  ;;  %v3477_v29 = vld [vmem:[%s4700_s5 + $0x108] sm:$0xff]  }
 0x1ff   :  { %2208 = vmatprep.subr.bf16.mxu1 %v3423_v59  ;;  %v3478_v59 = vld [vmem:[%s4700_s5 + $0x150] sm:$0xff]  }
 0x202   :  { %2209 = vmatpush1.bf16.msra.mxu1 %v3421_v1  ;;  %v3479_v1 = vld [vmem:[%s4700_s5 + $0x110] sm:$0xff]  }
 0x203   :  { %2210 = vmatprep.subr.bf16.mxu1 %v3426_v2  ;;  %v3480_v2 = vld [vmem:[%s4700_s5 + $0x158] sm:$0xff]  }
 0x206   :  { %2211 = vmatpush1.bf16.msra.mxu1 %v3424_v30  ;;  %v3481_v30 = vld [vmem:[%s4700_s5 + $0x118] sm:$0xff]  }
 0x207   :  { %2212 = vmatprep.subr.bf16.mxu1 %v3429_v3  ;;  %v3482_v3 = vld [vmem:[%s4700_s5 + $0x160] sm:$0xff]  }
 0x20a   :  { %2213 = vmatpush1.bf16.msra.mxu1 %v3427_v54  ;;  %v3483_v54 = vld [vmem:[%s4700_s5 + $0x120] sm:$0xff]  }
 0x20b   :  { %2214 = vmatprep.subr.bf16.mxu1 %v3432_v22  ;;  %v3484_v22 = vld [vmem:[%s4700_s5 + $0x168] sm:$0xff]  }
 0x20e   :  { %2215 = vmatpush1.bf16.msra.mxu1 %v3430_v12  ;;  %v3485_v12 = vld [vmem:[%s4700_s5 + $0x128] sm:$0xff]  }
 0x20f   :  { %2216 = vmatprep.subr.bf16.mxu1 %v3435_v35  ;;  %v3486_v35 = vld [vmem:[%s4700_s5 + $0x170] sm:$0xff]  }
 0x212   :  { %2217 = vmatpush1.bf16.msra.mxu1 %v3433_v4  ;;  %v3487_v4 = vld [vmem:[%s4700_s5 + $0x130] sm:$0xff]  }
 0x213   :  { %2218 = vmatprep.subr.bf16.mxu1 %v3438_v60  ;;  %v3488_v60 = vld [vmem:[%s4700_s5 + $0x178] sm:$0xff]  }
 0x216   :  { %2219 = vmatpush1.bf16.msra.mxu1 %v3436_v17  ;;  %v3489_v17 = vld [vmem:[%s4700_s5 + $0x138] sm:$0xff]  }
 0x217   :  { %2220 = vmatprep.subr.bf16.mxu1 %v3441_v40  ;;  %v1013_v40 = vsub.s32 4, %v4578_v15 }
 0x219   :  { %v1014_v52 = vrot.slane %v4584_v18, %v1013_v40 }
 0x21a   :  { %2221 = vmatpush1.bf16.msra.mxu1 %v3439_v49  ;;  %v1017_v49 = vsub.s32 5, %v4578_v15 }
 0x21c   :  { %v1018_v61 = vrot.slane %v4584_v18, %v1017_v49 }
 0x21d   :  { %2223 = vmatmul.mubr.bf16.vlgmr.msra.gmra.mrb[4].mxu1 %v4333_v43  ;;  %v1010_v43 = vrot.slane %v4584_v18, %v1009_v19  ;;  %v3011_v18 = vld [vmem:[%s4702_s6] ss:$0 sm:$0xff] }
 0x270   :  { %v2060_v53 = vpop.f32.mrb[0].mxu1  ;;  %v2142_v26 = vpop.f32.mrb[4].mxu0 }
 0x271   :  { %v3135_v45 = vadd.f32 %v2060_v53, %v998_v37  ;;  %v2062_v50 = vpop.f32.mrb[1].mxu1  ;;  %v2144_v5 = vpop.f32.mrb[5].mxu0  ;;  %v3137_v44 = vadd.f32 %v2142_v26, %v1006_v28 }
 0x272   :  { %v3136_v6 = vadd.f32 %v2062_v50, %v1002_v16  ;;  %v3138_v7 = vadd.f32 %v2144_v5, %v1010_v43  ;;  %v2064_v32 = vpop.f32.mrb[2].mxu1  ;;  %v2146_v8 = vpop.f32.mrb[6].mxu0 }
 0x273   :  { %v2231_v33 = vmax.f32 %v3135_v45, 0.0  ;;  %v2065_v14 = vpop.f32.mrb[3].mxu1  ;;  %v2147_v34 = vpop.f32.mrb[7].mxu0  ;;  %v2233_v56 = vmax.f32 %v3137_v44, 0.0 }
 0x274   :  { %v2232_v36 = vmax.f32 %v3136_v6, 0.0  ;;  %v2234_v38 = vmax.f32 %v3138_v7, 0.0 }
 0x275   :  { %v2237_v47 = vpack.c.bf16 %v2231_v33, %v2231_v33  ;;  %v2239_v10 = vpack.c.bf16 %v2233_v56, %v2233_v56 }
 0x276   :  { %v2238_v46 = vpack.c.bf16 %v2232_v36, %v2232_v36  ;;  %v2240_v48 = vpack.c.bf16 %v2234_v38, %v2234_v38 }
 0x278   :  { %2666 = vmatprep.mubr.bf16.mxu0 %v2238_v46 }
 0x279   :  { %2667 = vmatmul.mubr.bf16.vlgmr.msra.gmra.mrb[8].mxu0 %v2237_v47 }
 0x27a   :  { %3086 = vmatpush3.bf16.msra.mxu0 %v3459_v39  ;;  %2706 = vmatprep.mubr.bf16.mxu0 %v2240_v48 }
 0x27b   :  { %3087 = vmatprep.subr.bf16.mxu0 %v3460_v23 }
 0x27e   :  { %3088 = vmatpush3.bf16.msra.mxu0 %v3461_v41 }
 0x27f   :  { %3089 = vmatprep.subr.bf16.mxu0 %v3462_v42 }
 0x282   :  { %3090 = vmatpush3.bf16.msra.mxu0 %v3463_v51 }
 0x283   :  { %3091 = vmatprep.subr.bf16.mxu0 %v3464_v20 }
 0x286   :  { %3092 = vmatpush3.bf16.msra.mxu0 %v3465_v21 }
 0x287   :  { %3093 = vmatprep.subr.bf16.mxu0 %v3466_v25 }
 0x28a   :  { %3094 = vmatpush3.bf16.msra.mxu0 %v3467_v58 }
 0x28b   :  { %3095 = vmatprep.subr.bf16.mxu0 %v3468_v27 }
 0x28e   :  { %3096 = vmatpush3.bf16.msra.mxu0 %v3469_v0 }
 0x28f   :  { %3097 = vmatprep.subr.bf16.mxu0 %v3470_v13 }
 0x292   :  { %3098 = vmatpush3.bf16.msra.mxu0 %v3471_v31 }
 0x293   :  { %3099 = vmatprep.subr.bf16.mxu0 %v3472_v24 }
 0x296   :  { %3100 = vmatpush3.bf16.msra.mxu0 %v3473_v55 }
 0x297   :  { %3107 = vmatprep.subr.bf16.mxu0 %v3474_v9 }
 0x299   :  { %2707 = vmatmul.mubr.bf16.vlgmr.msra.gmra.mrb[12].mxu0 %v2239_v10 }
 0x29a   :  { %3108 = vmatpush3.bf16.msra.mxu0 %v3475_v57 }
 0x29b   :  { %3109 = vmatprep.subr.bf16.mxu0 %v3476_v11 }
 0x29e   :  { %3110 = vmatpush3.bf16.msra.mxu0 %v3477_v29 }
 0x29f   :  { %3111 = vmatprep.subr.bf16.mxu0 %v3478_v59 }
 0x2a2   :  { %3112 = vmatpush3.bf16.msra.mxu0 %v3479_v1 }
 0x2a3   :  { %3113 = vmatprep.subr.bf16.mxu0 %v3480_v2 }
 0x2a6   :  { %3114 = vmatpush3.bf16.msra.mxu0 %v3481_v30 }
 0x2a7   :  { %3115 = vmatprep.subr.bf16.mxu0 %v3482_v3 }
 0x2aa   :  { %3116 = vmatpush3.bf16.msra.mxu0 %v3483_v54 }
 0x2ab   :  { %3117 = vmatprep.subr.bf16.mxu0 %v3484_v22 }
 0x2ae   :  { %3118 = vmatpush3.bf16.msra.mxu0 %v3485_v12 }
 0x2af   :  { %3119 = vmatprep.subr.bf16.mxu0 %v3486_v35 }
 0x2b2   :  { %3120 = vmatpush3.bf16.msra.mxu0 %v3487_v4 }
 0x2b3   :  { %3121 = vmatprep.subr.bf16.mxu0 %v3488_v60 }
 0x2b6   :  { %3122 = vmatpush3.bf16.msra.mxu0 %v3489_v17 }
 0x2f0   :  { %v2224_v63 = vpop.f32.mrb[4].mxu1 }
 0x2f1   :  { %v3139_v19 = vadd.f32 %v2224_v63, %v1014_v52  ;;  %v2226_v37 = vpop.f32.mrb[5].mxu1 }
 0x2f2   :  { %v3140_v16 = vadd.f32 %v2226_v37, %v1018_v61  ;;  %v2228_v43 = vpop.f32.mrb[6].mxu1 }
 0x2f3   :  { %v2235_v53 = vmax.f32 %v3139_v19, 0.0  ;;  %v2229_v26 = vpop.f32.mrb[7].mxu1 }
 0x2f4   :  { %v2236_v45 = vmax.f32 %v3140_v16, 0.0 }
 0x2f5   :  { %v2241_v5 = vpack.c.bf16 %v2235_v53, %v2235_v53 }
 0x2f6   :  { %v2242_v50 = vpack.c.bf16 %v2236_v45, %v2236_v45 }
 0x2f8   :  { %2746 = vmatprep.mubr.bf16.mxu0 %v2242_v50 }
 0x2f9   :  { %2747 = vmatmul.mubr.bf16.vlgmr.msra.gmra.mrb[16].mxu0 %v2241_v5 }
 0x34c   :  { %v3079_v6 = vpop.f32.mrb[8].mxu0 }
 0x34d   :  { %v3080_v7 = vpop.f32.mrb[9].mxu0 }
 0x34e   :  { %v3081_v32 = vadd.f32 %v3080_v7, %v3079_v6  ;;  %v3082_v15 = vpop.f32.mrb[10].mxu0 }
 0x34f   :  { %v3083_v8 = vpop.f32.mrb[11].mxu0 }
 0x350   :  { %v2669_v34 = vadd.f32 %v3081_v32, %v3011_v18 }
 0x36c   :  { %v3101_v33 = vpop.f32.mrb[12].mxu0 }
 0x36d   :  { %v3102_v14 = vpop.f32.mrb[13].mxu0 }
 0x36e   :  { %v3103_v36 = vadd.f32 %v3102_v14, %v3101_v33  ;;  %v3104_v38 = vpop.f32.mrb[14].mxu0 }
 0x36f   :  { %v3105_v46 = vpop.f32.mrb[15].mxu0 }
 0x370   :  { %v2709_v39 = vadd.f32 %v3103_v36, %v2669_v34 }
 0x3cc   :  { %v3123_v47 = vpop.f32.mrb[16].mxu0 }
 0x3cd   :  { %v3124_v23 = vpop.f32.mrb[17].mxu0 }
 0x3ce   :  { %v3125_v48 = vadd.f32 %v3124_v23, %v3123_v47  ;;  %v3126_v41 = vpop.f32.mrb[18].mxu0 }
 0x3cf   :  { %v3127_v42 = vpop.f32.mrb[19].mxu0 }
 0x3d0   :  { %v2749_v51 = vadd.f32 %v3125_v48, %v2709_v39 }
 0x3d2   :  { %2754 = vst [vmem:[%s4703_s7] sm:$0xff] %v2749_v51 }

</bundles_post_ra>
